<compile_context>
chip_gen: v5e
topology: v5e:2x2
jax: 0.10.0
libtpu: 0.0.40
codegen_flags: <defaults>
</compile_context>

<pallas_src>
import math

import jax
import jax.numpy as jnp
from jax.experimental import pallas as pl
from jax.experimental.pallas import tpu as pltpu

# ---------------- configuration (small, TPU-friendly) ----------------
B, S = 2, 8          # batch, sequence
D = 32               # model width
H, DH = 2, 16        # heads, head dim
L = 2                # transformer layers
F = 64               # CLT features per layer (logical)
FP = 128             # CLT features padded to a full lane tile
V = 64               # vocab size (logical)
VP = 128             # vocab padded to a full lane tile

NEG = -1e9           # dtype-aware large negative (safe if ever cast to bf16)
SCALE = 1.0 / math.sqrt(DH)


def _layernorm(x, g, b):
    mu = jnp.mean(x, axis=-1, keepdims=True)
    xc = x - mu
    var = jnp.mean(xc * xc, axis=-1, keepdims=True)
    return xc * jax.lax.rsqrt(var + 1e-5) * g + b


# ---------------- fused whole-forward Pallas kernel (per-batch grid step) ----------------
def fused_forward_kernel(
    x_ref,        # (1, S, D)   token + position embeddings for this batch element
    mask_ref,     # (1, 1, S)   attention mask (1.0 keep / 0.0 pad)
    ln1_g_ref,    # (L, D)
    ln1_b_ref,    # (L, D)
    w_q_ref,      # (L, H, D, DH)
    w_k_ref,      # (L, H, D, DH)
    w_v_ref,      # (L, H, D, DH)
    b_q_ref,      # (L, H, DH)
    b_k_ref,      # (L, H, DH)
    b_v_ref,      # (L, H, DH)
    w_o_ref,      # (L, H, DH, D)   attention output projection, per head
    b_o_ref,      # (L, D)
    w_enc_ref,    # (L, D, FP)      CLT encoder (cols F..FP are zero)
    b_enc_ref,    # (L, FP)
    theta_ref,    # (L, FP)         JumpReLU thresholds
    w_dec_ref,    # (L_tgt, L_src*FP, D)  pre-concatenated decoder slabs (pad rows zero)
    b_dec_ref,    # (L, D)
    lnf_g_ref,    # (1, D)
    lnf_b_ref,    # (1, D)
    w_lm_ref,     # (D, VP)         cols V..VP are zero
    logits_ref,   # (1, S, VP)      output -- the only HBM-visible store (lane-dense)
    feat_ref,     # VMEM scratch (S, L*FP): per-source-layer CLT features
):
    x = x_ref[0]                                   # (S, D) residual stream in vregs

    # Hoisted out of the layer/head loops (JAX does not CSE broadcasts).
    pad_bias = (1.0 - mask_ref[0]) * NEG           # (1, S) key-side padding bias
    row = jax.lax.broadcasted_iota(jnp.int32, (S, S), 0)
    col = jax.lax.broadcasted_iota(jnp.int32, (S, S), 1)
    causal = col <= row

    ln1_g = ln1_g_ref[...]
    ln1_b = ln1_b_ref[...]
    b_q = b_q_ref[...]
    b_k = b_k_ref[...]
    b_v = b_v_ref[...]
    b_o = b_o_ref[...]
    b_enc = b_enc_ref[...]
    theta = theta_ref[...]
    b_dec = b_dec_ref[...]

    for l in range(L):
        # ---- attention sublayer (original model path) ----
        xn = _layernorm(x, ln1_g[l:l + 1, :], ln1_b[l:l + 1, :])

        attn_out = b_o[l:l + 1, :]                 # (1, D), broadcasts on first add
        for h in range(H):                         # H=2 static unroll; all lane-aligned
            q = jnp.dot(xn, w_q_ref[l, h], preferred_element_type=jnp.float32) \
                + b_q[l, h:h + 1]
            k = jnp.dot(xn, w_k_ref[l, h], preferred_element_type=jnp.float32) \
                + b_k[l, h:h + 1]
            v = jnp.dot(xn, w_v_ref[l, h], preferred_element_type=jnp.float32) \
                + b_v[l, h:h + 1]
            att = jnp.dot(q, k.T, preferred_element_type=jnp.float32) * SCALE
            att = att + pad_bias
            att = jnp.where(causal, att, NEG)
            m = jnp.max(att, axis=-1, keepdims=True)
            p = jnp.exp(att - m)
            p = p / jnp.sum(p, axis=-1, keepdims=True)
            o_h = jnp.dot(p, v, preferred_element_type=jnp.float32)       # (S, DH)
            # fold the output projection per head -> no lane concatenation
            attn_out = attn_out + jnp.dot(o_h, w_o_ref[l, h],
                                          preferred_element_type=jnp.float32)

        # pre-MLP residual stream = what the hooks capture / what the CLT reads
        h_res = x + attn_out

        # ---- CLT encode (JumpReLU), write into the persistent feature scratch ----
        pre = jnp.dot(h_res, w_enc_ref[l], preferred_element_type=jnp.float32) \
            + b_enc[l:l + 1, :]
        f_l = jnp.where(pre > theta[l:l + 1, :], pre, 0.0)                # (S, FP)
        feat_ref[:, l * FP:(l + 1) * FP] = f_l     # full lane-tile aligned store

        # ---- CLT cross-layer decode: ONE matmul over the concatenated source slab ----
        f_cat = feat_ref[:, : (l + 1) * FP]                               # (S, (l+1)*FP)
        recon = jnp.dot(f_cat, w_dec_ref[l, : (l + 1) * FP, :],
                        preferred_element_type=jnp.float32) + b_dec[l:l + 1, :]

        # replacement semantics: layer l's MLP output := CLT reconstruction
        x = h_res + recon

    xn = _layernorm(x, lnf_g_ref[...], lnf_b_ref[...])
    # lane-dense (S, 128) store: the kernel's only HBM write
    logits_ref[0] = jnp.dot(xn, w_lm_ref[...], preferred_element_type=jnp.float32)


def _rep_spec(shape):
    nd = len(shape)
    return pl.BlockSpec(tuple(shape), lambda b, _nd=nd: (0,) * _nd)


def _batch_spec(shape):
    nd = len(shape)
    blk = (1,) + tuple(shape[1:])
    return pl.BlockSpec(blk, lambda b, _nd=nd: (b,) + (0,) * (_nd - 1))


def fused_forward(x, mask3, p):
    bt, st, _ = x.shape
    weights = [
        p["ln1_g"], p["ln1_b"],
        p["w_q"], p["w_k"], p["w_v"], p["b_q"], p["b_k"], p["b_v"],
        p["w_o"], p["b_o"],
        p["clt_w_enc"], p["clt_b_enc"], p["clt_theta"],
        p["clt_w_dec"], p["clt_b_dec"],
        p["lnf_g"], p["lnf_b"], p["w_lm"],
    ]
    in_specs = [_batch_spec(x.shape), _batch_spec(mask3.shape)] \
        + [_rep_spec(w.shape) for w in weights]
    return pl.pallas_call(
        fused_forward_kernel,
        out_shape=jax.ShapeDtypeStruct((bt, st, VP), jnp.float32),
        grid=(bt,),
        in_specs=in_specs,
        out_specs=_batch_spec((bt, st, VP)),
        scratch_shapes=[pltpu.VMEM((st, L * FP), jnp.float32)],
        compiler_params=pltpu.CompilerParams(
            dimension_semantics=("parallel",),
            vmem_limit_bytes=32 * 1024 * 1024,
        ),
    )(x, mask3, *weights)


# ---------------- parameter construction (deterministic, pre-laid-out) ----------------
def init_params():
    key = jax.random.PRNGKey(0)
    ks = iter(jax.random.split(key, 40))

    def nrm(shape, scale=0.02):
        return (scale * jax.random.normal(next(ks), shape)).astype(jnp.float32)

    # CLT encoder, padded to FP lanes (pad columns zero)
    w_enc = jnp.zeros((L, D, FP), jnp.float32).at[:, :, :F].set(
        nrm((L, D, F), 1.0 / math.sqrt(D)))
    b_enc = jnp.zeros((L, FP), jnp.float32).at[:, :F].set(nrm((L, F)))
    theta = jnp.full((L, FP), 0.02, jnp.float32)

    # CLT decoder, stored directly in (tgt, src*FP, D) slab form (pad rows zero):
    # layer l's decode is a single K=(l+1)*FP matmul against a contiguous row slab.
    w_dec_raw = nrm((L, L, F, D), 1.0 / math.sqrt(F))          # (tgt, src, F, D)
    w_dec = jnp.zeros((L, L, FP, D), jnp.float32).at[:, :, :F, :].set(w_dec_raw)
    w_dec = w_dec.reshape(L, L * FP, D)

    # LM head padded to VP lanes (pad columns zero)
    w_lm = jnp.zeros((D, VP), jnp.float32).at[:, :V].set(nrm((D, V)))

    return {
        "wte": nrm((V, D)),
        "wpe": nrm((S, D)),
        "ln1_g": jnp.ones((L, D), jnp.float32),
        "ln1_b": jnp.zeros((L, D), jnp.float32),
        # head-major attention weights: no lane-misaligned slicing in the kernel
        "w_q": nrm((L, H, D, DH)),
        "w_k": nrm((L, H, D, DH)),
        "w_v": nrm((L, H, D, DH)),
        "b_q": nrm((L, H, DH)),
        "b_k": nrm((L, H, DH)),
        "b_v": nrm((L, H, DH)),
        "w_o": nrm((L, H, DH, D)),
        "b_o": nrm((L, D)),
        "lnf_g": jnp.ones((1, D), jnp.float32),
        "lnf_b": jnp.zeros((1, D), jnp.float32),
        "w_lm": w_lm,
        "clt_w_enc": w_enc,
        "clt_b_enc": b_enc,
        "clt_theta": theta,
        "clt_w_dec": w_dec,
        "clt_b_dec": nrm((L, D)),
    }


# ---------------- replacement-model forward ----------------
def replacement_model_forward(params, input_ids, attention_mask=None):
    b, s = input_ids.shape
    if attention_mask is None:
        attention_mask = jnp.ones_like(input_ids)

    # TODO(synk): token-embedding gather stays in plain JAX (tiny gather; no clean
    # Pallas win at this size).
    x = params["wte"][input_ids] + params["wpe"][jnp.arange(s)][None, :, :]
    x = x.astype(jnp.float32)                                  # (B, S, D)
    mask3 = attention_mask.astype(jnp.float32).reshape(b, 1, s)

    logits_p = fused_forward(x, mask3, params)                 # (B, S, VP)
    return logits_p[..., :V]                                   # slice padded vocab back


# ---------------- pure-JAX reference (same math, no Pallas) ----------------
def reference_forward(params, input_ids, attention_mask):
    b, s = input_ids.shape
    x = params["wte"][input_ids] + params["wpe"][jnp.arange(s)][None, :, :]
    x = x.astype(jnp.float32)                                  # (B, S, D)
    maskf = attention_mask.astype(jnp.float32)
    pad_bias = (1.0 - maskf)[:, None, None, :] * NEG           # (B, 1, 1, S)
    causal = jnp.tril(jnp.ones((s, s), bool))

    def ln(t, g, bb):
        mu = jnp.mean(t, -1, keepdims=True)
        tc = t - mu
        var = jnp.mean(tc * tc, -1, keepdims=True)
        return tc * jax.lax.rsqrt(var + 1e-5) * g + bb

    feats = []
    for l in range(L):
        xn = ln(x, params["ln1_g"][l], params["ln1_b"][l])
        q = jnp.einsum("bsd,hdk->bhsk", xn, params["w_q"][l]) \
            + params["b_q"][l][None, :, None, :]
        k = jnp.einsum("bsd,hdk->bhsk", xn, params["w_k"][l]) \
            + params["b_k"][l][None, :, None, :]
        v = jnp.einsum("bsd,hdk->bhsk", xn, params["w_v"][l]) \
            + params["b_v"][l][None, :, None, :]
        att = jnp.einsum("bhqd,bhkd->bhqk", q, k) * SCALE
        att = att + pad_bias
        att = jnp.where(causal[None, None], att, NEG)
        p = jax.nn.softmax(att, axis=-1)
        o = jnp.einsum("bhqk,bhkd->bhqd", p, v)
        attn_out = jnp.einsum("bhsd,hde->bse", o, params["w_o"][l]) \
            + params["b_o"][l][None, None, :]
        h_res = x + attn_out

        pre = jnp.einsum("bsd,df->bsf", h_res, params["clt_w_enc"][l]) \
            + params["clt_b_enc"][l][None, None, :]
        f_l = jnp.where(pre > params["clt_theta"][l][None, None, :], pre, 0.0)
        feats.append(f_l)
        f_cat = jnp.concatenate(feats, axis=-1)                # (B, S, (l+1)*FP)
        recon = jnp.einsum("bsk,kd->bsd", f_cat,
                           params["clt_w_dec"][l][: (l + 1) * FP]) \
            + params["clt_b_dec"][l][None, None, :]
        x = h_res + recon

    xn = ln(x, params["lnf_g"][0], params["lnf_b"][0])
    logits = jnp.einsum("bsd,dv->bsv", xn, params["w_lm"])
    return logits[..., :V]


if __name__ == "__main__":
    params = init_params()
    key = jax.random.PRNGKey(0)
    input_ids = jax.random.randint(key, (B, S), 0, V, dtype=jnp.int32)
    # partial padding on the second batch element to exercise the mask path
    attention_mask = jnp.ones((B, S), dtype=jnp.int32).at[1, -2:].set(0)

    fwd = jax.jit(replacement_model_forward)
    logits = fwd(params, input_ids, attention_mask)
    jax.block_until_ready(logits)

    ref = reference_forward(params, input_ids, attention_mask)

    assert logits.shape == (B, S, V)
    assert bool(jnp.all(jnp.isfinite(logits)))
    assert bool(jnp.allclose(logits, ref, atol=1e-3, rtol=1e-3))
    print("KERNEL_OK")
</pallas_src>

<mosaic_0001>
module attributes {stable_mosaic.version = 11 : i64} {
  func.func @fused_forward_kernel(%arg0: i32, %arg1: memref<1x8x32xf32, #tpu.memory_space<vmem>>, %arg2: memref<1x1x8xf32, #tpu.memory_space<vmem>>, %arg3: memref<2x32xf32, #tpu.memory_space<vmem>>, %arg4: memref<2x32xf32, #tpu.memory_space<vmem>>, %arg5: memref<2x2x32x16xf32, #tpu.memory_space<vmem>>, %arg6: memref<2x2x32x16xf32, #tpu.memory_space<vmem>>, %arg7: memref<2x2x32x16xf32, #tpu.memory_space<vmem>>, %arg8: memref<2x2x16xf32, #tpu.memory_space<vmem>>, %arg9: memref<2x2x16xf32, #tpu.memory_space<vmem>>, %arg10: memref<2x2x16xf32, #tpu.memory_space<vmem>>, %arg11: memref<2x2x16x32xf32, #tpu.memory_space<vmem>>, %arg12: memref<2x32xf32, #tpu.memory_space<vmem>>, %arg13: memref<2x32x128xf32, #tpu.memory_space<vmem>>, %arg14: memref<2x128xf32, #tpu.memory_space<vmem>>, %arg15: memref<2x128xf32, #tpu.memory_space<vmem>>, %arg16: memref<2x256x32xf32, #tpu.memory_space<vmem>>, %arg17: memref<2x32xf32, #tpu.memory_space<vmem>>, %arg18: memref<1x32xf32, #tpu.memory_space<vmem>>, %arg19: memref<1x32xf32, #tpu.memory_space<vmem>>, %arg20: memref<32x128xf32, #tpu.memory_space<vmem>>, %arg21: memref<1x8x128xf32, #tpu.memory_space<vmem>>, %arg22: memref<8x256xf32, #tpu.memory_space<vmem>>) attributes {dimension_semantics = [#tpu.dimension_semantics<parallel>], iteration_bounds = array<i64: 2>, scalar_prefetch = 0 : i64, scratch_operands = 1 : i64, tpu.core_type = #tpu.core_type<tc>, window_params = [{transform_indices = @transform_0, window_bounds = array<i64: 1, 8, 32>}, {transform_indices = @transform_1, window_bounds = array<i64: 1, 1, 8>}, {pipeline_mode = #tpu.pipeline_mode<synchronous>, transform_indices = @transform_2, window_bounds = array<i64: 2, 32>}, {pipeline_mode = #tpu.pipeline_mode<synchronous>, transform_indices = @transform_3, window_bounds = array<i64: 2, 32>}, {pipeline_mode = #tpu.pipeline_mode<synchronous>, transform_indices = @transform_4, window_bounds = array<i64: 2, 2, 32, 16>}, {pipeline_mode = #tpu.pipeline_mode<synchronous>, transform_indices = @transform_5, window_bounds = array<i64: 2, 2, 32, 16>}, {pipeline_mode = #tpu.pipeline_mode<synchronous>, transform_indices = @transform_6, window_bounds = array<i64: 2, 2, 32, 16>}, {pipeline_mode = #tpu.pipeline_mode<synchronous>, transform_indices = @transform_7, window_bounds = array<i64: 2, 2, 16>}, {pipeline_mode = #tpu.pipeline_mode<synchronous>, transform_indices = @transform_8, window_bounds = array<i64: 2, 2, 16>}, {pipeline_mode = #tpu.pipeline_mode<synchronous>, transform_indices = @transform_9, window_bounds = array<i64: 2, 2, 16>}, {pipeline_mode = #tpu.pipeline_mode<synchronous>, transform_indices = @transform_10, window_bounds = array<i64: 2, 2, 16, 32>}, {pipeline_mode = #tpu.pipeline_mode<synchronous>, transform_indices = @transform_11, window_bounds = array<i64: 2, 32>}, {pipeline_mode = #tpu.pipeline_mode<synchronous>, transform_indices = @transform_12, window_bounds = array<i64: 2, 32, 128>}, {pipeline_mode = #tpu.pipeline_mode<synchronous>, transform_indices = @transform_13, window_bounds = array<i64: 2, 128>}, {pipeline_mode = #tpu.pipeline_mode<synchronous>, transform_indices = @transform_14, window_bounds = array<i64: 2, 128>}, {pipeline_mode = #tpu.pipeline_mode<synchronous>, transform_indices = @transform_15, window_bounds = array<i64: 2, 256, 32>}, {pipeline_mode = #tpu.pipeline_mode<synchronous>, transform_indices = @transform_16, window_bounds = array<i64: 2, 32>}, {pipeline_mode = #tpu.pipeline_mode<synchronous>, transform_indices = @transform_17, window_bounds = array<i64: 1, 32>}, {pipeline_mode = #tpu.pipeline_mode<synchronous>, transform_indices = @transform_18, window_bounds = array<i64: 1, 32>}, {pipeline_mode = #tpu.pipeline_mode<synchronous>, transform_indices = @transform_19, window_bounds = array<i64: 32, 128>}, {transform_indices = @transform_20, window_bounds = array<i64: 1, 8, 128>}]} {
    %c0 = arith.constant 0 : index
    %c0_0 = arith.constant 0 : index
    %c0_1 = arith.constant 0 : index
    %0 = vector.load %arg1[%c0, %c0_0, %c0_1] : memref<1x8x32xf32, #tpu.memory_space<vmem>>, vector<1x8x32xf32>
    %1 = vector.shape_cast %0 : vector<1x8x32xf32> to vector<8x32xf32>
    %c0_2 = arith.constant 0 : index
    %c0_3 = arith.constant 0 : index
    %c0_4 = arith.constant 0 : index
    %2 = vector.load %arg2[%c0_2, %c0_3, %c0_4] : memref<1x1x8xf32, #tpu.memory_space<vmem>>, vector<1x1x8xf32>
    %3 = vector.shape_cast %2 : vector<1x1x8xf32> to vector<1x8xf32>
    %cst = arith.constant 1.000000e+00 : f32
    %4 = vector.broadcast %cst : f32 to vector<1x8xf32>
    %5 = arith.subf %4, %3 : vector<1x8xf32>
    %cst_5 = arith.constant -1.000000e+09 : f32
    %6 = vector.broadcast %cst_5 : f32 to vector<1x8xf32>
    %7 = arith.mulf %5, %6 : vector<1x8xf32>
    %8 = tpu.iota {dimensions = array<i32: 0>} : vector<8x8xi32>
    %9 = tpu.iota {dimensions = array<i32: 1>} : vector<8x8xi32>
    %10 = arith.cmpi sle, %9, %8 : vector<8x8xi32>
    %c0_6 = arith.constant 0 : index
    %c0_7 = arith.constant 0 : index
    %11 = vector.load %arg3[%c0_6, %c0_7] : memref<2x32xf32, #tpu.memory_space<vmem>>, vector<2x32xf32>
    %c0_8 = arith.constant 0 : index
    %c0_9 = arith.constant 0 : index
    %12 = vector.load %arg4[%c0_8, %c0_9] : memref<2x32xf32, #tpu.memory_space<vmem>>, vector<2x32xf32>
    %c0_10 = arith.constant 0 : index
    %c0_11 = arith.constant 0 : index
    %c0_12 = arith.constant 0 : index
    %13 = vector.load %arg8[%c0_10, %c0_11, %c0_12] : memref<2x2x16xf32, #tpu.memory_space<vmem>>, vector<2x2x16xf32>
    %c0_13 = arith.constant 0 : index
    %c0_14 = arith.constant 0 : index
    %c0_15 = arith.constant 0 : index
    %14 = vector.load %arg9[%c0_13, %c0_14, %c0_15] : memref<2x2x16xf32, #tpu.memory_space<vmem>>, vector<2x2x16xf32>
    %c0_16 = arith.constant 0 : index
    %c0_17 = arith.constant 0 : index
    %c0_18 = arith.constant 0 : index
    %15 = vector.load %arg10[%c0_16, %c0_17, %c0_18] : memref<2x2x16xf32, #tpu.memory_space<vmem>>, vector<2x2x16xf32>
    %c0_19 = arith.constant 0 : index
    %c0_20 = arith.constant 0 : index
    %16 = vector.load %arg12[%c0_19, %c0_20] : memref<2x32xf32, #tpu.memory_space<vmem>>, vector<2x32xf32>
    %c0_21 = arith.constant 0 : index
    %c0_22 = arith.constant 0 : index
    %17 = vector.load %arg14[%c0_21, %c0_22] : memref<2x128xf32, #tpu.memory_space<vmem>>, vector<2x128xf32>
    %c0_23 = arith.constant 0 : index
    %c0_24 = arith.constant 0 : index
    %18 = vector.load %arg15[%c0_23, %c0_24] : memref<2x128xf32, #tpu.memory_space<vmem>>, vector<2x128xf32>
    %c0_25 = arith.constant 0 : index
    %c0_26 = arith.constant 0 : index
    %19 = vector.load %arg17[%c0_25, %c0_26] : memref<2x32xf32, #tpu.memory_space<vmem>>, vector<2x32xf32>
    %20 = vector.extract_strided_slice %11 {offsets = [0, 0], sizes = [1, 32], strides = [1, 1]} : vector<2x32xf32> to vector<1x32xf32>
    %21 = vector.extract_strided_slice %12 {offsets = [0, 0], sizes = [1, 32], strides = [1, 1]} : vector<2x32xf32> to vector<1x32xf32>
    %cst_27 = arith.constant dense<0.000000e+00> : vector<8xf32>
    %22 = vector.multi_reduction <add>, %1, %cst_27 [1] : vector<8x32xf32> to vector<8xf32>
    %23 = vector.shape_cast %22 : vector<8xf32> to vector<8x1xf32>
    %cst_28 = arith.constant 3.200000e+01 : f32
    %24 = vector.broadcast %cst_28 : f32 to vector<8x1xf32>
    %25 = arith.divf %23, %24 : vector<8x1xf32>
    %26 = vector.broadcast %25 : vector<8x1xf32> to vector<8x32xf32>
    %27 = arith.subf %1, %26 : vector<8x32xf32>
    %28 = arith.mulf %27, %27 : vector<8x32xf32>
    %cst_29 = arith.constant dense<0.000000e+00> : vector<8xf32>
    %29 = vector.multi_reduction <add>, %28, %cst_29 [1] : vector<8x32xf32> to vector<8xf32>
    %30 = vector.shape_cast %29 : vector<8xf32> to vector<8x1xf32>
    %cst_30 = arith.constant 3.200000e+01 : f32
    %31 = vector.broadcast %cst_30 : f32 to vector<8x1xf32>
    %32 = arith.divf %30, %31 : vector<8x1xf32>
    %cst_31 = arith.constant 9.99999974E-6 : f32
    %33 = vector.broadcast %cst_31 : f32 to vector<8x1xf32>
    %34 = arith.addf %32, %33 : vector<8x1xf32>
    %35 = math.rsqrt %34 : vector<8x1xf32>
    %36 = vector.broadcast %35 : vector<8x1xf32> to vector<8x32xf32>
    %37 = arith.mulf %27, %36 : vector<8x32xf32>
    %38 = vector.broadcast %20 : vector<1x32xf32> to vector<8x32xf32>
    %39 = arith.mulf %37, %38 : vector<8x32xf32>
    %40 = vector.broadcast %21 : vector<1x32xf32> to vector<8x32xf32>
    %41 = arith.addf %39, %40 : vector<8x32xf32>
    %42 = vector.extract_strided_slice %16 {offsets = [0, 0], sizes = [1, 32], strides = [1, 1]} : vector<2x32xf32> to vector<1x32xf32>
    %c0_32 = arith.constant 0 : index
    %c0_33 = arith.constant 0 : index
    %c0_34 = arith.constant 0 : index
    %c0_35 = arith.constant 0 : index
    %43 = vector.load %arg5[%c0_32, %c0_33, %c0_34, %c0_35] : memref<2x2x32x16xf32, #tpu.memory_space<vmem>>, vector<1x1x32x16xf32>
    %44 = vector.shape_cast %43 : vector<1x1x32x16xf32> to vector<32x16xf32>
    %cst_36 = arith.constant dense<0.000000e+00> : vector<8x16xf32>
    %45 = tpu.matmul %41, %44, %cst_36 {dimension_numbers = #tpu.dot_dimension_numbers<[1], [0], [0], [1], [0, 0, 1, 1], [], []>} : vector<8x32xf32>, vector<32x16xf32>, vector<8x16xf32> -> vector<8x16xf32>
    %46 = vector.extract_strided_slice %13 {offsets = [0, 0, 0], sizes = [1, 1, 16], strides = [1, 1, 1]} : vector<2x2x16xf32> to vector<1x1x16xf32>
    %47 = vector.shape_cast %46 : vector<1x1x16xf32> to vector<1x16xf32>
    %48 = vector.broadcast %47 : vector<1x16xf32> to vector<8x16xf32>
    %49 = arith.addf %45, %48 : vector<8x16xf32>
    %c0_37 = arith.constant 0 : index
    %c0_38 = arith.constant 0 : index
    %c0_39 = arith.constant 0 : index
    %c0_40 = arith.constant 0 : index
    %50 = vector.load %arg6[%c0_37, %c0_38, %c0_39, %c0_40] : memref<2x2x32x16xf32, #tpu.memory_space<vmem>>, vector<1x1x32x16xf32>
    %51 = vector.shape_cast %50 : vector<1x1x32x16xf32> to vector<32x16xf32>
    %cst_41 = arith.constant dense<0.000000e+00> : vector<8x16xf32>
    %52 = tpu.matmul %41, %51, %cst_41 {dimension_numbers = #tpu.dot_dimension_numbers<[1], [0], [0], [1], [0, 0, 1, 1], [], []>} : vector<8x32xf32>, vector<32x16xf32>, vector<8x16xf32> -> vector<8x16xf32>
    %53 = vector.extract_strided_slice %14 {offsets = [0, 0, 0], sizes = [1, 1, 16], strides = [1, 1, 1]} : vector<2x2x16xf32> to vector<1x1x16xf32>
    %54 = vector.shape_cast %53 : vector<1x1x16xf32> to vector<1x16xf32>
    %55 = vector.broadcast %54 : vector<1x16xf32> to vector<8x16xf32>
    %56 = arith.addf %52, %55 : vector<8x16xf32>
    %c0_42 = arith.constant 0 : index
    %c0_43 = arith.constant 0 : index
    %c0_44 = arith.constant 0 : index
    %c0_45 = arith.constant 0 : index
    %57 = vector.load %arg7[%c0_42, %c0_43, %c0_44, %c0_45] : memref<2x2x32x16xf32, #tpu.memory_space<vmem>>, vector<1x1x32x16xf32>
    %58 = vector.shape_cast %57 : vector<1x1x32x16xf32> to vector<32x16xf32>
    %cst_46 = arith.constant dense<0.000000e+00> : vector<8x16xf32>
    %59 = tpu.matmul %41, %58, %cst_46 {dimension_numbers = #tpu.dot_dimension_numbers<[1], [0], [0], [1], [0, 0, 1, 1], [], []>} : vector<8x32xf32>, vector<32x16xf32>, vector<8x16xf32> -> vector<8x16xf32>
    %60 = vector.extract_strided_slice %15 {offsets = [0, 0, 0], sizes = [1, 1, 16], strides = [1, 1, 1]} : vector<2x2x16xf32> to vector<1x1x16xf32>
    %61 = vector.shape_cast %60 : vector<1x1x16xf32> to vector<1x16xf32>
    %62 = vector.broadcast %61 : vector<1x16xf32> to vector<8x16xf32>
    %63 = arith.addf %59, %62 : vector<8x16xf32>
    %64 = tpu.transpose %56, [1, 0] : vector<8x16xf32> -> vector<16x8xf32>
    %cst_47 = arith.constant dense<0.000000e+00> : vector<8x8xf32>
    %65 = tpu.matmul %49, %64, %cst_47 {dimension_numbers = #tpu.dot_dimension_numbers<[1], [0], [0], [1], [0, 0, 1, 1], [], []>} : vector<8x16xf32>, vector<16x8xf32>, vector<8x8xf32> -> vector<8x8xf32>
    %cst_48 = arith.constant 2.500000e-01 : f32
    %66 = vector.broadcast %cst_48 : f32 to vector<8x8xf32>
    %67 = arith.mulf %65, %66 : vector<8x8xf32>
    %68 = vector.broadcast %7 : vector<1x8xf32> to vector<8x8xf32>
    %69 = arith.addf %67, %68 : vector<8x8xf32>
    %cst_49 = arith.constant -1.000000e+09 : f32
    %70 = vector.broadcast %cst_49 : f32 to vector<8x8xf32>
    %71 = arith.select %10, %69, %70 : vector<8x8xi1>, vector<8x8xf32>
    %cst_50 = arith.constant dense<0xFF800000> : vector<8xf32>
    %72 = vector.multi_reduction <maximumf>, %71, %cst_50 [1] : vector<8x8xf32> to vector<8xf32>
    %73 = vector.shape_cast %72 : vector<8xf32> to vector<8x1xf32>
    %74 = vector.broadcast %73 : vector<8x1xf32> to vector<8x8xf32>
    %75 = arith.subf %71, %74 : vector<8x8xf32>
    %76 = math.exp %75 : vector<8x8xf32>
    %cst_51 = arith.constant dense<0.000000e+00> : vector<8xf32>
    %77 = vector.multi_reduction <add>, %76, %cst_51 [1] : vector<8x8xf32> to vector<8xf32>
    %78 = vector.shape_cast %77 : vector<8xf32> to vector<8x1xf32>
    %79 = vector.broadcast %78 : vector<8x1xf32> to vector<8x8xf32>
    %80 = arith.divf %76, %79 : vector<8x8xf32>
    %cst_52 = arith.constant dense<0.000000e+00> : vector<8x16xf32>
    %81 = tpu.matmul %80, %63, %cst_52 {dimension_numbers = #tpu.dot_dimension_numbers<[1], [0], [0], [1], [0, 0, 1, 1], [], []>} : vector<8x8xf32>, vector<8x16xf32>, vector<8x16xf32> -> vector<8x16xf32>
    %c0_53 = arith.constant 0 : index
    %c0_54 = arith.constant 0 : index
    %c0_55 = arith.constant 0 : index
    %c0_56 = arith.constant 0 : index
    %82 = vector.load %arg11[%c0_53, %c0_54, %c0_55, %c0_56] : memref<2x2x16x32xf32, #tpu.memory_space<vmem>>, vector<1x1x16x32xf32>
    %83 = vector.shape_cast %82 : vector<1x1x16x32xf32> to vector<16x32xf32>
    %cst_57 = arith.constant dense<0.000000e+00> : vector<8x32xf32>
    %84 = tpu.matmul %81, %83, %cst_57 {dimension_numbers = #tpu.dot_dimension_numbers<[1], [0], [0], [1], [0, 0, 1, 1], [], []>} : vector<8x16xf32>, vector<16x32xf32>, vector<8x32xf32> -> vector<8x32xf32>
    %85 = vector.broadcast %42 : vector<1x32xf32> to vector<8x32xf32>
    %86 = arith.addf %85, %84 : vector<8x32xf32>
    %c0_58 = arith.constant 0 : index
    %c1 = arith.constant 1 : index
    %c0_59 = arith.constant 0 : index
    %c0_60 = arith.constant 0 : index
    %87 = vector.load %arg5[%c0_58, %c1, %c0_59, %c0_60] : memref<2x2x32x16xf32, #tpu.memory_space<vmem>>, vector<1x1x32x16xf32>
    %88 = vector.shape_cast %87 : vector<1x1x32x16xf32> to vector<32x16xf32>
    %cst_61 = arith.constant dense<0.000000e+00> : vector<8x16xf32>
    %89 = tpu.matmul %41, %88, %cst_61 {dimension_numbers = #tpu.dot_dimension_numbers<[1], [0], [0], [1], [0, 0, 1, 1], [], []>} : vector<8x32xf32>, vector<32x16xf32>, vector<8x16xf32> -> vector<8x16xf32>
    %90 = vector.extract_strided_slice %13 {offsets = [0, 1, 0], sizes = [1, 1, 16], strides = [1, 1, 1]} : vector<2x2x16xf32> to vector<1x1x16xf32>
    %91 = vector.shape_cast %90 : vector<1x1x16xf32> to vector<1x16xf32>
    %92 = vector.broadcast %91 : vector<1x16xf32> to vector<8x16xf32>
    %93 = arith.addf %89, %92 : vector<8x16xf32>
    %c0_62 = arith.constant 0 : index
    %c1_63 = arith.constant 1 : index
    %c0_64 = arith.constant 0 : index
    %c0_65 = arith.constant 0 : index
    %94 = vector.load %arg6[%c0_62, %c1_63, %c0_64, %c0_65] : memref<2x2x32x16xf32, #tpu.memory_space<vmem>>, vector<1x1x32x16xf32>
    %95 = vector.shape_cast %94 : vector<1x1x32x16xf32> to vector<32x16xf32>
    %cst_66 = arith.constant dense<0.000000e+00> : vector<8x16xf32>
    %96 = tpu.matmul %41, %95, %cst_66 {dimension_numbers = #tpu.dot_dimension_numbers<[1], [0], [0], [1], [0, 0, 1, 1], [], []>} : vector<8x32xf32>, vector<32x16xf32>, vector<8x16xf32> -> vector<8x16xf32>
    %97 = vector.extract_strided_slice %14 {offsets = [0, 1, 0], sizes = [1, 1, 16], strides = [1, 1, 1]} : vector<2x2x16xf32> to vector<1x1x16xf32>
    %98 = vector.shape_cast %97 : vector<1x1x16xf32> to vector<1x16xf32>
    %99 = vector.broadcast %98 : vector<1x16xf32> to vector<8x16xf32>
    %100 = arith.addf %96, %99 : vector<8x16xf32>
    %c0_67 = arith.constant 0 : index
    %c1_68 = arith.constant 1 : index
    %c0_69 = arith.constant 0 : index
    %c0_70 = arith.constant 0 : index
    %101 = vector.load %arg7[%c0_67, %c1_68, %c0_69, %c0_70] : memref<2x2x32x16xf32, #tpu.memory_space<vmem>>, vector<1x1x32x16xf32>
    %102 = vector.shape_cast %101 : vector<1x1x32x16xf32> to vector<32x16xf32>
    %cst_71 = arith.constant dense<0.000000e+00> : vector<8x16xf32>
    %103 = tpu.matmul %41, %102, %cst_71 {dimension_numbers = #tpu.dot_dimension_numbers<[1], [0], [0], [1], [0, 0, 1, 1], [], []>} : vector<8x32xf32>, vector<32x16xf32>, vector<8x16xf32> -> vector<8x16xf32>
    %104 = vector.extract_strided_slice %15 {offsets = [0, 1, 0], sizes = [1, 1, 16], strides = [1, 1, 1]} : vector<2x2x16xf32> to vector<1x1x16xf32>
    %105 = vector.shape_cast %104 : vector<1x1x16xf32> to vector<1x16xf32>
    %106 = vector.broadcast %105 : vector<1x16xf32> to vector<8x16xf32>
    %107 = arith.addf %103, %106 : vector<8x16xf32>
    %108 = tpu.transpose %100, [1, 0] : vector<8x16xf32> -> vector<16x8xf32>
    %cst_72 = arith.constant dense<0.000000e+00> : vector<8x8xf32>
    %109 = tpu.matmul %93, %108, %cst_72 {dimension_numbers = #tpu.dot_dimension_numbers<[1], [0], [0], [1], [0, 0, 1, 1], [], []>} : vector<8x16xf32>, vector<16x8xf32>, vector<8x8xf32> -> vector<8x8xf32>
    %cst_73 = arith.constant 2.500000e-01 : f32
    %110 = vector.broadcast %cst_73 : f32 to vector<8x8xf32>
    %111 = arith.mulf %109, %110 : vector<8x8xf32>
    %112 = vector.broadcast %7 : vector<1x8xf32> to vector<8x8xf32>
    %113 = arith.addf %111, %112 : vector<8x8xf32>
    %cst_74 = arith.constant -1.000000e+09 : f32
    %114 = vector.broadcast %cst_74 : f32 to vector<8x8xf32>
    %115 = arith.select %10, %113, %114 : vector<8x8xi1>, vector<8x8xf32>
    %cst_75 = arith.constant dense<0xFF800000> : vector<8xf32>
    %116 = vector.multi_reduction <maximumf>, %115, %cst_75 [1] : vector<8x8xf32> to vector<8xf32>
    %117 = vector.shape_cast %116 : vector<8xf32> to vector<8x1xf32>
    %118 = vector.broadcast %117 : vector<8x1xf32> to vector<8x8xf32>
    %119 = arith.subf %115, %118 : vector<8x8xf32>
    %120 = math.exp %119 : vector<8x8xf32>
    %cst_76 = arith.constant dense<0.000000e+00> : vector<8xf32>
    %121 = vector.multi_reduction <add>, %120, %cst_76 [1] : vector<8x8xf32> to vector<8xf32>
    %122 = vector.shape_cast %121 : vector<8xf32> to vector<8x1xf32>
    %123 = vector.broadcast %122 : vector<8x1xf32> to vector<8x8xf32>
    %124 = arith.divf %120, %123 : vector<8x8xf32>
    %cst_77 = arith.constant dense<0.000000e+00> : vector<8x16xf32>
    %125 = tpu.matmul %124, %107, %cst_77 {dimension_numbers = #tpu.dot_dimension_numbers<[1], [0], [0], [1], [0, 0, 1, 1], [], []>} : vector<8x8xf32>, vector<8x16xf32>, vector<8x16xf32> -> vector<8x16xf32>
    %c0_78 = arith.constant 0 : index
    %c1_79 = arith.constant 1 : index
    %c0_80 = arith.constant 0 : index
    %c0_81 = arith.constant 0 : index
    %126 = vector.load %arg11[%c0_78, %c1_79, %c0_80, %c0_81] : memref<2x2x16x32xf32, #tpu.memory_space<vmem>>, vector<1x1x16x32xf32>
    %127 = vector.shape_cast %126 : vector<1x1x16x32xf32> to vector<16x32xf32>
    %cst_82 = arith.constant dense<0.000000e+00> : vector<8x32xf32>
    %128 = tpu.matmul %125, %127, %cst_82 {dimension_numbers = #tpu.dot_dimension_numbers<[1], [0], [0], [1], [0, 0, 1, 1], [], []>} : vector<8x16xf32>, vector<16x32xf32>, vector<8x32xf32> -> vector<8x32xf32>
    %129 = arith.addf %86, %128 : vector<8x32xf32>
    %130 = arith.addf %1, %129 : vector<8x32xf32>
    %c0_83 = arith.constant 0 : index
    %c0_84 = arith.constant 0 : index
    %c0_85 = arith.constant 0 : index
    %131 = vector.load %arg13[%c0_83, %c0_84, %c0_85] : memref<2x32x128xf32, #tpu.memory_space<vmem>>, vector<1x32x128xf32>
    %132 = vector.shape_cast %131 : vector<1x32x128xf32> to vector<32x128xf32>
    %cst_86 = arith.constant dense<0.000000e+00> : vector<8x128xf32>
    %133 = tpu.matmul %130, %132, %cst_86 {dimension_numbers = #tpu.dot_dimension_numbers<[1], [0], [0], [1], [0, 0, 1, 1], [], []>} : vector<8x32xf32>, vector<32x128xf32>, vector<8x128xf32> -> vector<8x128xf32>
    %134 = vector.extract_strided_slice %17 {offsets = [0, 0], sizes = [1, 128], strides = [1, 1]} : vector<2x128xf32> to vector<1x128xf32>
    %135 = vector.broadcast %134 : vector<1x128xf32> to vector<8x128xf32>
    %136 = arith.addf %133, %135 : vector<8x128xf32>
    %137 = vector.extract_strided_slice %18 {offsets = [0, 0], sizes = [1, 128], strides = [1, 1]} : vector<2x128xf32> to vector<1x128xf32>
    %138 = vector.broadcast %137 : vector<1x128xf32> to vector<8x128xf32>
    %139 = arith.cmpf ogt, %136, %138 : vector<8x128xf32>
    %cst_87 = arith.constant 0.000000e+00 : f32
    %140 = vector.broadcast %cst_87 : f32 to vector<8x128xf32>
    %141 = arith.select %139, %136, %140 : vector<8x128xi1>, vector<8x128xf32>
    %c0_88 = arith.constant 0 : index
    %c0_89 = arith.constant 0 : index
    %142 = vector.load %arg22[%c0_88, %c0_89] : memref<8x256xf32, #tpu.memory_space<vmem>>, vector<8x128xf32>
    tpu.vector_store %arg22[%c0_88, %c0_89], %141 {strides = array<i32>} : memref<8x256xf32, #tpu.memory_space<vmem>>, vector<8x128xf32>,
    %c0_90 = arith.constant 0 : index
    %c0_91 = arith.constant 0 : index
    %143 = vector.load %arg22[%c0_90, %c0_91] : memref<8x256xf32, #tpu.memory_space<vmem>>, vector<8x128xf32>
    %c0_92 = arith.constant 0 : index
    %c0_93 = arith.constant 0 : index
    %c0_94 = arith.constant 0 : index
    %144 = vector.load %arg16[%c0_92, %c0_93, %c0_94] : memref<2x256x32xf32, #tpu.memory_space<vmem>>, vector<1x128x32xf32>
    %145 = vector.shape_cast %144 : vector<1x128x32xf32> to vector<128x32xf32>
    %cst_95 = arith.constant dense<0.000000e+00> : vector<8x32xf32>
    %146 = tpu.matmul %143, %145, %cst_95 {dimension_numbers = #tpu.dot_dimension_numbers<[1], [0], [0], [1], [0, 0, 1, 1], [], []>} : vector<8x128xf32>, vector<128x32xf32>, vector<8x32xf32> -> vector<8x32xf32>
    %147 = vector.extract_strided_slice %19 {offsets = [0, 0], sizes = [1, 32], strides = [1, 1]} : vector<2x32xf32> to vector<1x32xf32>
    %148 = vector.broadcast %147 : vector<1x32xf32> to vector<8x32xf32>
    %149 = arith.addf %146, %148 : vector<8x32xf32>
    %150 = arith.addf %130, %149 : vector<8x32xf32>
    %151 = vector.extract_strided_slice %11 {offsets = [1, 0], sizes = [1, 32], strides = [1, 1]} : vector<2x32xf32> to vector<1x32xf32>
    %152 = vector.extract_strided_slice %12 {offsets = [1, 0], sizes = [1, 32], strides = [1, 1]} : vector<2x32xf32> to vector<1x32xf32>
    %cst_96 = arith.constant dense<0.000000e+00> : vector<8xf32>
    %153 = vector.multi_reduction <add>, %150, %cst_96 [1] : vector<8x32xf32> to vector<8xf32>
    %154 = vector.shape_cast %153 : vector<8xf32> to vector<8x1xf32>
    %cst_97 = arith.constant 3.200000e+01 : f32
    %155 = vector.broadcast %cst_97 : f32 to vector<8x1xf32>
    %156 = arith.divf %154, %155 : vector<8x1xf32>
    %157 = vector.broadcast %156 : vector<8x1xf32> to vector<8x32xf32>
    %158 = arith.subf %150, %157 : vector<8x32xf32>
    %159 = arith.mulf %158, %158 : vector<8x32xf32>
    %cst_98 = arith.constant dense<0.000000e+00> : vector<8xf32>
    %160 = vector.multi_reduction <add>, %159, %cst_98 [1] : vector<8x32xf32> to vector<8xf32>
    %161 = vector.shape_cast %160 : vector<8xf32> to vector<8x1xf32>
    %cst_99 = arith.constant 3.200000e+01 : f32
    %162 = vector.broadcast %cst_99 : f32 to vector<8x1xf32>
    %163 = arith.divf %161, %162 : vector<8x1xf32>
    %cst_100 = arith.constant 9.99999974E-6 : f32
    %164 = vector.broadcast %cst_100 : f32 to vector<8x1xf32>
    %165 = arith.addf %163, %164 : vector<8x1xf32>
    %166 = math.rsqrt %165 : vector<8x1xf32>
    %167 = vector.broadcast %166 : vector<8x1xf32> to vector<8x32xf32>
    %168 = arith.mulf %158, %167 : vector<8x32xf32>
    %169 = vector.broadcast %151 : vector<1x32xf32> to vector<8x32xf32>
    %170 = arith.mulf %168, %169 : vector<8x32xf32>
    %171 = vector.broadcast %152 : vector<1x32xf32> to vector<8x32xf32>
    %172 = arith.addf %170, %171 : vector<8x32xf32>
    %173 = vector.extract_strided_slice %16 {offsets = [1, 0], sizes = [1, 32], strides = [1, 1]} : vector<2x32xf32> to vector<1x32xf32>
    %c1_101 = arith.constant 1 : index
    %c0_102 = arith.constant 0 : index
    %c0_103 = arith.constant 0 : index
    %c0_104 = arith.constant 0 : index
    %174 = vector.load %arg5[%c1_101, %c0_102, %c0_103, %c0_104] : memref<2x2x32x16xf32, #tpu.memory_space<vmem>>, vector<1x1x32x16xf32>
    %175 = vector.shape_cast %174 : vector<1x1x32x16xf32> to vector<32x16xf32>
    %cst_105 = arith.constant dense<0.000000e+00> : vector<8x16xf32>
    %176 = tpu.matmul %172, %175, %cst_105 {dimension_numbers = #tpu.dot_dimension_numbers<[1], [0], [0], [1], [0, 0, 1, 1], [], []>} : vector<8x32xf32>, vector<32x16xf32>, vector<8x16xf32> -> vector<8x16xf32>
    %177 = vector.extract_strided_slice %13 {offsets = [1, 0, 0], sizes = [1, 1, 16], strides = [1, 1, 1]} : vector<2x2x16xf32> to vector<1x1x16xf32>
    %178 = vector.shape_cast %177 : vector<1x1x16xf32> to vector<1x16xf32>
    %179 = vector.broadcast %178 : vector<1x16xf32> to vector<8x16xf32>
    %180 = arith.addf %176, %179 : vector<8x16xf32>
    %c1_106 = arith.constant 1 : index
    %c0_107 = arith.constant 0 : index
    %c0_108 = arith.constant 0 : index
    %c0_109 = arith.constant 0 : index
    %181 = vector.load %arg6[%c1_106, %c0_107, %c0_108, %c0_109] : memref<2x2x32x16xf32, #tpu.memory_space<vmem>>, vector<1x1x32x16xf32>
    %182 = vector.shape_cast %181 : vector<1x1x32x16xf32> to vector<32x16xf32>
    %cst_110 = arith.constant dense<0.000000e+00> : vector<8x16xf32>
    %183 = tpu.matmul %172, %182, %cst_110 {dimension_numbers = #tpu.dot_dimension_numbers<[1], [0], [0], [1], [0, 0, 1, 1], [], []>} : vector<8x32xf32>, vector<32x16xf32>, vector<8x16xf32> -> vector<8x16xf32>
    %184 = vector.extract_strided_slice %14 {offsets = [1, 0, 0], sizes = [1, 1, 16], strides = [1, 1, 1]} : vector<2x2x16xf32> to vector<1x1x16xf32>
    %185 = vector.shape_cast %184 : vector<1x1x16xf32> to vector<1x16xf32>
    %186 = vector.broadcast %185 : vector<1x16xf32> to vector<8x16xf32>
    %187 = arith.addf %183, %186 : vector<8x16xf32>
    %c1_111 = arith.constant 1 : index
    %c0_112 = arith.constant 0 : index
    %c0_113 = arith.constant 0 : index
    %c0_114 = arith.constant 0 : index
    %188 = vector.load %arg7[%c1_111, %c0_112, %c0_113, %c0_114] : memref<2x2x32x16xf32, #tpu.memory_space<vmem>>, vector<1x1x32x16xf32>
    %189 = vector.shape_cast %188 : vector<1x1x32x16xf32> to vector<32x16xf32>
    %cst_115 = arith.constant dense<0.000000e+00> : vector<8x16xf32>
    %190 = tpu.matmul %172, %189, %cst_115 {dimension_numbers = #tpu.dot_dimension_numbers<[1], [0], [0], [1], [0, 0, 1, 1], [], []>} : vector<8x32xf32>, vector<32x16xf32>, vector<8x16xf32> -> vector<8x16xf32>
    %191 = vector.extract_strided_slice %15 {offsets = [1, 0, 0], sizes = [1, 1, 16], strides = [1, 1, 1]} : vector<2x2x16xf32> to vector<1x1x16xf32>
    %192 = vector.shape_cast %191 : vector<1x1x16xf32> to vector<1x16xf32>
    %193 = vector.broadcast %192 : vector<1x16xf32> to vector<8x16xf32>
    %194 = arith.addf %190, %193 : vector<8x16xf32>
    %195 = tpu.transpose %187, [1, 0] : vector<8x16xf32> -> vector<16x8xf32>
    %cst_116 = arith.constant dense<0.000000e+00> : vector<8x8xf32>
    %196 = tpu.matmul %180, %195, %cst_116 {dimension_numbers = #tpu.dot_dimension_numbers<[1], [0], [0], [1], [0, 0, 1, 1], [], []>} : vector<8x16xf32>, vector<16x8xf32>, vector<8x8xf32> -> vector<8x8xf32>
    %cst_117 = arith.constant 2.500000e-01 : f32
    %197 = vector.broadcast %cst_117 : f32 to vector<8x8xf32>
    %198 = arith.mulf %196, %197 : vector<8x8xf32>
    %199 = vector.broadcast %7 : vector<1x8xf32> to vector<8x8xf32>
    %200 = arith.addf %198, %199 : vector<8x8xf32>
    %cst_118 = arith.constant -1.000000e+09 : f32
    %201 = vector.broadcast %cst_118 : f32 to vector<8x8xf32>
    %202 = arith.select %10, %200, %201 : vector<8x8xi1>, vector<8x8xf32>
    %cst_119 = arith.constant dense<0xFF800000> : vector<8xf32>
    %203 = vector.multi_reduction <maximumf>, %202, %cst_119 [1] : vector<8x8xf32> to vector<8xf32>
    %204 = vector.shape_cast %203 : vector<8xf32> to vector<8x1xf32>
    %205 = vector.broadcast %204 : vector<8x1xf32> to vector<8x8xf32>
    %206 = arith.subf %202, %205 : vector<8x8xf32>
    %207 = math.exp %206 : vector<8x8xf32>
    %cst_120 = arith.constant dense<0.000000e+00> : vector<8xf32>
    %208 = vector.multi_reduction <add>, %207, %cst_120 [1] : vector<8x8xf32> to vector<8xf32>
    %209 = vector.shape_cast %208 : vector<8xf32> to vector<8x1xf32>
    %210 = vector.broadcast %209 : vector<8x1xf32> to vector<8x8xf32>
    %211 = arith.divf %207, %210 : vector<8x8xf32>
    %cst_121 = arith.constant dense<0.000000e+00> : vector<8x16xf32>
    %212 = tpu.matmul %211, %194, %cst_121 {dimension_numbers = #tpu.dot_dimension_numbers<[1], [0], [0], [1], [0, 0, 1, 1], [], []>} : vector<8x8xf32>, vector<8x16xf32>, vector<8x16xf32> -> vector<8x16xf32>
    %c1_122 = arith.constant 1 : index
    %c0_123 = arith.constant 0 : index
    %c0_124 = arith.constant 0 : index
    %c0_125 = arith.constant 0 : index
    %213 = vector.load %arg11[%c1_122, %c0_123, %c0_124, %c0_125] : memref<2x2x16x32xf32, #tpu.memory_space<vmem>>, vector<1x1x16x32xf32>
    %214 = vector.shape_cast %213 : vector<1x1x16x32xf32> to vector<16x32xf32>
    %cst_126 = arith.constant dense<0.000000e+00> : vector<8x32xf32>
    %215 = tpu.matmul %212, %214, %cst_126 {dimension_numbers = #tpu.dot_dimension_numbers<[1], [0], [0], [1], [0, 0, 1, 1], [], []>} : vector<8x16xf32>, vector<16x32xf32>, vector<8x32xf32> -> vector<8x32xf32>
    %216 = vector.broadcast %173 : vector<1x32xf32> to vector<8x32xf32>
    %217 = arith.addf %216, %215 : vector<8x32xf32>
    %c1_127 = arith.constant 1 : index
    %c1_128 = arith.constant 1 : index
    %c0_129 = arith.constant 0 : index
    %c0_130 = arith.constant 0 : index
    %218 = vector.load %arg5[%c1_127, %c1_128, %c0_129, %c0_130] : memref<2x2x32x16xf32, #tpu.memory_space<vmem>>, vector<1x1x32x16xf32>
    %219 = vector.shape_cast %218 : vector<1x1x32x16xf32> to vector<32x16xf32>
    %cst_131 = arith.constant dense<0.000000e+00> : vector<8x16xf32>
    %220 = tpu.matmul %172, %219, %cst_131 {dimension_numbers = #tpu.dot_dimension_numbers<[1], [0], [0], [1], [0, 0, 1, 1], [], []>} : vector<8x32xf32>, vector<32x16xf32>, vector<8x16xf32> -> vector<8x16xf32>
    %221 = vector.extract_strided_slice %13 {offsets = [1, 1, 0], sizes = [1, 1, 16], strides = [1, 1, 1]} : vector<2x2x16xf32> to vector<1x1x16xf32>
    %222 = vector.shape_cast %221 : vector<1x1x16xf32> to vector<1x16xf32>
    %223 = vector.broadcast %222 : vector<1x16xf32> to vector<8x16xf32>
    %224 = arith.addf %220, %223 : vector<8x16xf32>
    %c1_132 = arith.constant 1 : index
    %c1_133 = arith.constant 1 : index
    %c0_134 = arith.constant 0 : index
    %c0_135 = arith.constant 0 : index
    %225 = vector.load %arg6[%c1_132, %c1_133, %c0_134, %c0_135] : memref<2x2x32x16xf32, #tpu.memory_space<vmem>>, vector<1x1x32x16xf32>
    %226 = vector.shape_cast %225 : vector<1x1x32x16xf32> to vector<32x16xf32>
    %cst_136 = arith.constant dense<0.000000e+00> : vector<8x16xf32>
    %227 = tpu.matmul %172, %226, %cst_136 {dimension_numbers = #tpu.dot_dimension_numbers<[1], [0], [0], [1], [0, 0, 1, 1], [], []>} : vector<8x32xf32>, vector<32x16xf32>, vector<8x16xf32> -> vector<8x16xf32>
    %228 = vector.extract_strided_slice %14 {offsets = [1, 1, 0], sizes = [1, 1, 16], strides = [1, 1, 1]} : vector<2x2x16xf32> to vector<1x1x16xf32>
    %229 = vector.shape_cast %228 : vector<1x1x16xf32> to vector<1x16xf32>
    %230 = vector.broadcast %229 : vector<1x16xf32> to vector<8x16xf32>
    %231 = arith.addf %227, %230 : vector<8x16xf32>
    %c1_137 = arith.constant 1 : index
    %c1_138 = arith.constant 1 : index
    %c0_139 = arith.constant 0 : index
    %c0_140 = arith.constant 0 : index
    %232 = vector.load %arg7[%c1_137, %c1_138, %c0_139, %c0_140] : memref<2x2x32x16xf32, #tpu.memory_space<vmem>>, vector<1x1x32x16xf32>
    %233 = vector.shape_cast %232 : vector<1x1x32x16xf32> to vector<32x16xf32>
    %cst_141 = arith.constant dense<0.000000e+00> : vector<8x16xf32>
    %234 = tpu.matmul %172, %233, %cst_141 {dimension_numbers = #tpu.dot_dimension_numbers<[1], [0], [0], [1], [0, 0, 1, 1], [], []>} : vector<8x32xf32>, vector<32x16xf32>, vector<8x16xf32> -> vector<8x16xf32>
    %235 = vector.extract_strided_slice %15 {offsets = [1, 1, 0], sizes = [1, 1, 16], strides = [1, 1, 1]} : vector<2x2x16xf32> to vector<1x1x16xf32>
    %236 = vector.shape_cast %235 : vector<1x1x16xf32> to vector<1x16xf32>
    %237 = vector.broadcast %236 : vector<1x16xf32> to vector<8x16xf32>
    %238 = arith.addf %234, %237 : vector<8x16xf32>
    %239 = tpu.transpose %231, [1, 0] : vector<8x16xf32> -> vector<16x8xf32>
    %cst_142 = arith.constant dense<0.000000e+00> : vector<8x8xf32>
    %240 = tpu.matmul %224, %239, %cst_142 {dimension_numbers = #tpu.dot_dimension_numbers<[1], [0], [0], [1], [0, 0, 1, 1], [], []>} : vector<8x16xf32>, vector<16x8xf32>, vector<8x8xf32> -> vector<8x8xf32>
    %cst_143 = arith.constant 2.500000e-01 : f32
    %241 = vector.broadcast %cst_143 : f32 to vector<8x8xf32>
    %242 = arith.mulf %240, %241 : vector<8x8xf32>
    %243 = vector.broadcast %7 : vector<1x8xf32> to vector<8x8xf32>
    %244 = arith.addf %242, %243 : vector<8x8xf32>
    %cst_144 = arith.constant -1.000000e+09 : f32
    %245 = vector.broadcast %cst_144 : f32 to vector<8x8xf32>
    %246 = arith.select %10, %244, %245 : vector<8x8xi1>, vector<8x8xf32>
    %cst_145 = arith.constant dense<0xFF800000> : vector<8xf32>
    %247 = vector.multi_reduction <maximumf>, %246, %cst_145 [1] : vector<8x8xf32> to vector<8xf32>
    %248 = vector.shape_cast %247 : vector<8xf32> to vector<8x1xf32>
    %249 = vector.broadcast %248 : vector<8x1xf32> to vector<8x8xf32>
    %250 = arith.subf %246, %249 : vector<8x8xf32>
    %251 = math.exp %250 : vector<8x8xf32>
    %cst_146 = arith.constant dense<0.000000e+00> : vector<8xf32>
    %252 = vector.multi_reduction <add>, %251, %cst_146 [1] : vector<8x8xf32> to vector<8xf32>
    %253 = vector.shape_cast %252 : vector<8xf32> to vector<8x1xf32>
    %254 = vector.broadcast %253 : vector<8x1xf32> to vector<8x8xf32>
    %255 = arith.divf %251, %254 : vector<8x8xf32>
    %cst_147 = arith.constant dense<0.000000e+00> : vector<8x16xf32>
    %256 = tpu.matmul %255, %238, %cst_147 {dimension_numbers = #tpu.dot_dimension_numbers<[1], [0], [0], [1], [0, 0, 1, 1], [], []>} : vector<8x8xf32>, vector<8x16xf32>, vector<8x16xf32> -> vector<8x16xf32>
    %c1_148 = arith.constant 1 : index
    %c1_149 = arith.constant 1 : index
    %c0_150 = arith.constant 0 : index
    %c0_151 = arith.constant 0 : index
    %257 = vector.load %arg11[%c1_148, %c1_149, %c0_150, %c0_151] : memref<2x2x16x32xf32, #tpu.memory_space<vmem>>, vector<1x1x16x32xf32>
    %258 = vector.shape_cast %257 : vector<1x1x16x32xf32> to vector<16x32xf32>
    %cst_152 = arith.constant dense<0.000000e+00> : vector<8x32xf32>
    %259 = tpu.matmul %256, %258, %cst_152 {dimension_numbers = #tpu.dot_dimension_numbers<[1], [0], [0], [1], [0, 0, 1, 1], [], []>} : vector<8x16xf32>, vector<16x32xf32>, vector<8x32xf32> -> vector<8x32xf32>
    %260 = arith.addf %217, %259 : vector<8x32xf32>
    %261 = arith.addf %150, %260 : vector<8x32xf32>
    %c1_153 = arith.constant 1 : index
    %c0_154 = arith.constant 0 : index
    %c0_155 = arith.constant 0 : index
    %262 = vector.load %arg13[%c1_153, %c0_154, %c0_155] : memref<2x32x128xf32, #tpu.memory_space<vmem>>, vector<1x32x128xf32>
    %263 = vector.shape_cast %262 : vector<1x32x128xf32> to vector<32x128xf32>
    %cst_156 = arith.constant dense<0.000000e+00> : vector<8x128xf32>
    %264 = tpu.matmul %261, %263, %cst_156 {dimension_numbers = #tpu.dot_dimension_numbers<[1], [0], [0], [1], [0, 0, 1, 1], [], []>} : vector<8x32xf32>, vector<32x128xf32>, vector<8x128xf32> -> vector<8x128xf32>
    %265 = vector.extract_strided_slice %17 {offsets = [1, 0], sizes = [1, 128], strides = [1, 1]} : vector<2x128xf32> to vector<1x128xf32>
    %266 = vector.broadcast %265 : vector<1x128xf32> to vector<8x128xf32>
    %267 = arith.addf %264, %266 : vector<8x128xf32>
    %268 = vector.extract_strided_slice %18 {offsets = [1, 0], sizes = [1, 128], strides = [1, 1]} : vector<2x128xf32> to vector<1x128xf32>
    %269 = vector.broadcast %268 : vector<1x128xf32> to vector<8x128xf32>
    %270 = arith.cmpf ogt, %267, %269 : vector<8x128xf32>
    %cst_157 = arith.constant 0.000000e+00 : f32
    %271 = vector.broadcast %cst_157 : f32 to vector<8x128xf32>
    %272 = arith.select %270, %267, %271 : vector<8x128xi1>, vector<8x128xf32>
    %c0_158 = arith.constant 0 : index
    %c128 = arith.constant 128 : index
    %273 = vector.load %arg22[%c0_158, %c128] : memref<8x256xf32, #tpu.memory_space<vmem>>, vector<8x128xf32>
    tpu.vector_store %arg22[%c0_158, %c128], %272 {strides = array<i32>} : memref<8x256xf32, #tpu.memory_space<vmem>>, vector<8x128xf32>,
    %c0_159 = arith.constant 0 : index
    %c0_160 = arith.constant 0 : index
    %274 = vector.load %arg22[%c0_159, %c0_160] : memref<8x256xf32, #tpu.memory_space<vmem>>, vector<8x256xf32>
    %c1_161 = arith.constant 1 : index
    %c0_162 = arith.constant 0 : index
    %c0_163 = arith.constant 0 : index
    %275 = vector.load %arg16[%c1_161, %c0_162, %c0_163] : memref<2x256x32xf32, #tpu.memory_space<vmem>>, vector<1x256x32xf32>
    %276 = vector.shape_cast %275 : vector<1x256x32xf32> to vector<256x32xf32>
    %cst_164 = arith.constant dense<0.000000e+00> : vector<8x32xf32>
    %277 = tpu.matmul %274, %276, %cst_164 {dimension_numbers = #tpu.dot_dimension_numbers<[1], [0], [0], [1], [0, 0, 1, 1], [], []>} : vector<8x256xf32>, vector<256x32xf32>, vector<8x32xf32> -> vector<8x32xf32>
    %278 = vector.extract_strided_slice %19 {offsets = [1, 0], sizes = [1, 32], strides = [1, 1]} : vector<2x32xf32> to vector<1x32xf32>
    %279 = vector.broadcast %278 : vector<1x32xf32> to vector<8x32xf32>
    %280 = arith.addf %277, %279 : vector<8x32xf32>
    %281 = arith.addf %261, %280 : vector<8x32xf32>
    %c0_165 = arith.constant 0 : index
    %c0_166 = arith.constant 0 : index
    %282 = vector.load %arg18[%c0_165, %c0_166] : memref<1x32xf32, #tpu.memory_space<vmem>>, vector<1x32xf32>
    %c0_167 = arith.constant 0 : index
    %c0_168 = arith.constant 0 : index
    %283 = vector.load %arg19[%c0_167, %c0_168] : memref<1x32xf32, #tpu.memory_space<vmem>>, vector<1x32xf32>
    %cst_169 = arith.constant dense<0.000000e+00> : vector<8xf32>
    %284 = vector.multi_reduction <add>, %281, %cst_169 [1] : vector<8x32xf32> to vector<8xf32>
    %285 = vector.shape_cast %284 : vector<8xf32> to vector<8x1xf32>
    %cst_170 = arith.constant 3.200000e+01 : f32
    %286 = vector.broadcast %cst_170 : f32 to vector<8x1xf32>
    %287 = arith.divf %285, %286 : vector<8x1xf32>
    %288 = vector.broadcast %287 : vector<8x1xf32> to vector<8x32xf32>
    %289 = arith.subf %281, %288 : vector<8x32xf32>
    %290 = arith.mulf %289, %289 : vector<8x32xf32>
    %cst_171 = arith.constant dense<0.000000e+00> : vector<8xf32>
    %291 = vector.multi_reduction <add>, %290, %cst_171 [1] : vector<8x32xf32> to vector<8xf32>
    %292 = vector.shape_cast %291 : vector<8xf32> to vector<8x1xf32>
    %cst_172 = arith.constant 3.200000e+01 : f32
    %293 = vector.broadcast %cst_172 : f32 to vector<8x1xf32>
    %294 = arith.divf %292, %293 : vector<8x1xf32>
    %cst_173 = arith.constant 9.99999974E-6 : f32
    %295 = vector.broadcast %cst_173 : f32 to vector<8x1xf32>
    %296 = arith.addf %294, %295 : vector<8x1xf32>
    %297 = math.rsqrt %296 : vector<8x1xf32>
    %298 = vector.broadcast %297 : vector<8x1xf32> to vector<8x32xf32>
    %299 = arith.mulf %289, %298 : vector<8x32xf32>
    %300 = vector.broadcast %282 : vector<1x32xf32> to vector<8x32xf32>
    %301 = arith.mulf %299, %300 : vector<8x32xf32>
    %302 = vector.broadcast %283 : vector<1x32xf32> to vector<8x32xf32>
    %303 = arith.addf %301, %302 : vector<8x32xf32>
    %c0_174 = arith.constant 0 : index
    %c0_175 = arith.constant 0 : index
    %304 = vector.load %arg20[%c0_174, %c0_175] : memref<32x128xf32, #tpu.memory_space<vmem>>, vector<32x128xf32>
    %cst_176 = arith.constant dense<0.000000e+00> : vector<8x128xf32>
    %305 = tpu.matmul %303, %304, %cst_176 {dimension_numbers = #tpu.dot_dimension_numbers<[1], [0], [0], [1], [0, 0, 1, 1], [], []>} : vector<8x32xf32>, vector<32x128xf32>, vector<8x128xf32> -> vector<8x128xf32>
    %c0_177 = arith.constant 0 : index
    %c0_178 = arith.constant 0 : index
    %c0_179 = arith.constant 0 : index
    %306 = vector.load %arg21[%c0_177, %c0_178, %c0_179] : memref<1x8x128xf32, #tpu.memory_space<vmem>>, vector<1x8x128xf32>
    %307 = vector.shape_cast %306 : vector<1x8x128xf32> to vector<8x128xf32>
    %308 = vector.shape_cast %305 : vector<8x128xf32> to vector<1x8x128xf32>
    tpu.vector_store %arg21[%c0_177, %c0_178, %c0_179], %308 {strides = array<i32>} : memref<1x8x128xf32, #tpu.memory_space<vmem>>, vector<1x8x128xf32>,
    return
  }
  func.func @transform_0(%arg0: i32) -> (i32, i32, i32) {
    %c0_i32 = arith.constant 0 : i32
    %c0_i32_0 = arith.constant 0 : i32
    %c0_i32_1 = arith.constant 0 : i32
    return %arg0, %c0_i32, %c0_i32_0 : i32, i32, i32
  }
  func.func @transform_1(%arg0: i32) -> (i32, i32, i32) {
    %c0_i32 = arith.constant 0 : i32
    %c0_i32_0 = arith.constant 0 : i32
    %c0_i32_1 = arith.constant 0 : i32
    return %arg0, %c0_i32, %c0_i32_0 : i32, i32, i32
  }
  func.func @transform_2(%arg0: i32) -> (i32, i32) {
    %c0_i32 = arith.constant 0 : i32
    %c0_i32_0 = arith.constant 0 : i32
    %c0_i32_1 = arith.constant 0 : i32
    return %c0_i32, %c0_i32_0 : i32, i32
  }
  func.func @transform_3(%arg0: i32) -> (i32, i32) {
    %c0_i32 = arith.constant 0 : i32
    %c0_i32_0 = arith.constant 0 : i32
    %c0_i32_1 = arith.constant 0 : i32
    return %c0_i32, %c0_i32_0 : i32, i32
  }
  func.func @transform_4(%arg0: i32) -> (i32, i32, i32, i32) {
    %c0_i32 = arith.constant 0 : i32
    %c0_i32_0 = arith.constant 0 : i32
    %c0_i32_1 = arith.constant 0 : i32
    %c0_i32_2 = arith.constant 0 : i32
    %c0_i32_3 = arith.constant 0 : i32
    return %c0_i32, %c0_i32_0, %c0_i32_1, %c0_i32_2 : i32, i32, i32, i32
  }
  func.func @transform_5(%arg0: i32) -> (i32, i32, i32, i32) {
    %c0_i32 = arith.constant 0 : i32
    %c0_i32_0 = arith.constant 0 : i32
    %c0_i32_1 = arith.constant 0 : i32
    %c0_i32_2 = arith.constant 0 : i32
    %c0_i32_3 = arith.constant 0 : i32
    return %c0_i32, %c0_i32_0, %c0_i32_1, %c0_i32_2 : i32, i32, i32, i32
  }
  func.func @transform_6(%arg0: i32) -> (i32, i32, i32, i32) {
    %c0_i32 = arith.constant 0 : i32
    %c0_i32_0 = arith.constant 0 : i32
    %c0_i32_1 = arith.constant 0 : i32
    %c0_i32_2 = arith.constant 0 : i32
    %c0_i32_3 = arith.constant 0 : i32
    return %c0_i32, %c0_i32_0, %c0_i32_1, %c0_i32_2 : i32, i32, i32, i32
  }
  func.func @transform_7(%arg0: i32) -> (i32, i32, i32) {
    %c0_i32 = arith.constant 0 : i32
    %c0_i32_0 = arith.constant 0 : i32
    %c0_i32_1 = arith.constant 0 : i32
    %c0_i32_2 = arith.constant 0 : i32
    return %c0_i32, %c0_i32_0, %c0_i32_1 : i32, i32, i32
  }
  func.func @transform_8(%arg0: i32) -> (i32, i32, i32) {
    %c0_i32 = arith.constant 0 : i32
    %c0_i32_0 = arith.constant 0 : i32
    %c0_i32_1 = arith.constant 0 : i32
    %c0_i32_2 = arith.constant 0 : i32
    return %c0_i32, %c0_i32_0, %c0_i32_1 : i32, i32, i32
  }
  func.func @transform_9(%arg0: i32) -> (i32, i32, i32) {
    %c0_i32 = arith.constant 0 : i32
    %c0_i32_0 = arith.constant 0 : i32
    %c0_i32_1 = arith.constant 0 : i32
    %c0_i32_2 = arith.constant 0 : i32
    return %c0_i32, %c0_i32_0, %c0_i32_1 : i32, i32, i32
  }
  func.func @transform_10(%arg0: i32) -> (i32, i32, i32, i32) {
    %c0_i32 = arith.constant 0 : i32
    %c0_i32_0 = arith.constant 0 : i32
    %c0_i32_1 = arith.constant 0 : i32
    %c0_i32_2 = arith.constant 0 : i32
    %c0_i32_3 = arith.constant 0 : i32
    return %c0_i32, %c0_i32_0, %c0_i32_1, %c0_i32_2 : i32, i32, i32, i32
  }
  func.func @transform_11(%arg0: i32) -> (i32, i32) {
    %c0_i32 = arith.constant 0 : i32
    %c0_i32_0 = arith.constant 0 : i32
    %c0_i32_1 = arith.constant 0 : i32
    return %c0_i32, %c0_i32_0 : i32, i32
  }
  func.func @transform_12(%arg0: i32) -> (i32, i32, i32) {
    %c0_i32 = arith.constant 0 : i32
    %c0_i32_0 = arith.constant 0 : i32
    %c0_i32_1 = arith.constant 0 : i32
    %c0_i32_2 = arith.constant 0 : i32
    return %c0_i32, %c0_i32_0, %c0_i32_1 : i32, i32, i32
  }
  func.func @transform_13(%arg0: i32) -> (i32, i32) {
    %c0_i32 = arith.constant 0 : i32
    %c0_i32_0 = arith.constant 0 : i32
    %c0_i32_1 = arith.constant 0 : i32
    return %c0_i32, %c0_i32_0 : i32, i32
  }
  func.func @transform_14(%arg0: i32) -> (i32, i32) {
    %c0_i32 = arith.constant 0 : i32
    %c0_i32_0 = arith.constant 0 : i32
    %c0_i32_1 = arith.constant 0 : i32
    return %c0_i32, %c0_i32_0 : i32, i32
  }
  func.func @transform_15(%arg0: i32) -> (i32, i32, i32) {
    %c0_i32 = arith.constant 0 : i32
    %c0_i32_0 = arith.constant 0 : i32
    %c0_i32_1 = arith.constant 0 : i32
    %c0_i32_2 = arith.constant 0 : i32
    return %c0_i32, %c0_i32_0, %c0_i32_1 : i32, i32, i32
  }
  func.func @transform_16(%arg0: i32) -> (i32, i32) {
    %c0_i32 = arith.constant 0 : i32
    %c0_i32_0 = arith.constant 0 : i32
    %c0_i32_1 = arith.constant 0 : i32
    return %c0_i32, %c0_i32_0 : i32, i32
  }
  func.func @transform_17(%arg0: i32) -> (i32, i32) {
    %c0_i32 = arith.constant 0 : i32
    %c0_i32_0 = arith.constant 0 : i32
    %c0_i32_1 = arith.constant 0 : i32
    return %c0_i32, %c0_i32_0 : i32, i32
  }
  func.func @transform_18(%arg0: i32) -> (i32, i32) {
    %c0_i32 = arith.constant 0 : i32
    %c0_i32_0 = arith.constant 0 : i32
    %c0_i32_1 = arith.constant 0 : i32
    return %c0_i32, %c0_i32_0 : i32, i32
  }
  func.func @transform_19(%arg0: i32) -> (i32, i32) {
    %c0_i32 = arith.constant 0 : i32
    %c0_i32_0 = arith.constant 0 : i32
    %c0_i32_1 = arith.constant 0 : i32
    return %c0_i32, %c0_i32_0 : i32, i32
  }
  func.func @transform_20(%arg0: i32) -> (i32, i32, i32) {
    %c0_i32 = arith.constant 0 : i32
    %c0_i32_0 = arith.constant 0 : i32
    %c0_i32_1 = arith.constant 0 : i32
    return %arg0, %c0_i32, %c0_i32_0 : i32, i32, i32
  }
}

</mosaic_0001>

<bundles_post_ra>
// kernel: replacement_model_forward.1
= control target key start
LH: loop header
LB: loop body
LE: loop exit
PB: predicated region body
PF: predicated region fallthrough
CT: control target
= control target key end

     0   :  { %s2786_s0 = inlined_call_operand.vmem [shape: f32[2,8,32], index: 0, kind: input, shape index: {}]   ;;  %s2787_s1 = inlined_call_operand.vmem [shape: f32[2,1,8], index: 1, kind: input, shape index: {}]   ;;  %s2788_s2 = inlined_call_operand.vmem [shape: f32[2,32], index: 2, kind: input, shape index: {}]   ;;  %s2789_s3 = inlined_call_operand.vmem [shape: f32[2,32], index: 3, kind: input, shape index: {}]   ;;  %s2790_s4 = inlined_call_operand.vmem [shape: f32[2,2,32,16], index: 4, kind: input, shape index: {}]   ;;  %s2791_s5 = inlined_call_operand.vmem [shape: f32[2,2,32,16], index: 5, kind: input, shape index: {}]   ;;  %s2792_s6 = inlined_call_operand.vmem [shape: f32[2,2,32,16], index: 6, kind: input, shape index: {}]   ;;  %s2793_s7 = inlined_call_operand.vmem [shape: f32[2,2,16], index: 7, kind: input, shape index: {}]   ;;  %s2794_s8 = inlined_call_operand.vmem [shape: f32[2,2,16], index: 8, kind: input, shape index: {}]   ;;  %s2795_s9 = inlined_call_operand.vmem [shape: f32[2,2,16], index: 9, kind: input, shape index: {}]   ;;  %s2796_s10 = inlined_call_operand.vmem [shape: f32[2,2,16,32], index: 10, kind: input, shape index: {}]   ;;  %s2797_s11 = inlined_call_operand.vmem [shape: f32[2,32], index: 11, kind: input, shape index: {}]   ;;  %s2798_s12 = inlined_call_operand.vmem [shape: f32[2,32,128], index: 12, kind: input, shape index: {}]   ;;  %s2799_s13 = inlined_call_operand.vmem [shape: f32[2,128], index: 13, kind: input, shape index: {}]   ;;  %s2800_s14 = inlined_call_operand.vmem [shape: f32[2,128], index: 14, kind: input, shape index: {}]   ;;  %s2801_s15 = inlined_call_operand.vmem [shape: f32[2,256,32], index: 15, kind: input, shape index: {}]   ;;  %s2802_s16 = inlined_call_operand.vmem [shape: f32[2,32], index: 16, kind: input, shape index: {}]   ;;  %s2803_s17 = inlined_call_operand.vmem [shape: f32[1,32], index: 17, kind: input, shape index: {}]   ;;  %s2804_s18 = inlined_call_operand.vmem [shape: f32[1,32], index: 18, kind: input, shape index: {}]   ;;  %s2805_s19 = inlined_call_operand.vmem [shape: f32[32,128], index: 19, kind: input, shape index: {}]   ;;  %s2806_s20 = inlined_call_operand.hbm [shape: f32[2,8,128], index: 20, kind: output, shape index: {}]  }
   0x1   :  { %2814 = sst [smem:[#allocation12_spill]] %s2786_s0 }
   0x2   :  { %2815 = sst [smem:[#allocation13_spill]] %s2787_s1 }
   0x3   :  { %2816 = sst [smem:[#allocation14_spill]] %s2788_s2 }
   0x4   :  { %2817 = sst [smem:[#allocation15_spill]] %s2789_s3 }
   0x5   :  { %2818 = sst [smem:[#allocation16_spill]] %s2790_s4 }
   0x6   :  { %2819 = sst [smem:[#allocation17_spill]] %s2791_s5 }
   0x7   :  { %2820 = sst [smem:[#allocation18_spill]] %s2792_s6 }
   0x8   :  { %25 = vsyncpa [#allocation4], 0 }
   0x9   :  { %27 = vsyncpa [#allocation4 + $0x1], 0  ;;  %s2138_s1 = smov 0   ;;  %s2140_s22 = smov 0  }
   0xa   :  { %s2142_s23 = smov 0   ;;  %s2144_s24 = smov 0  }
   0xb LB: > { %2821 = sst [smem:[#allocation6_spill]] %s2018_s1  ;;  %s2159_s2 = sadd.s32 4294967295, %s2030_s24   ;;  %s2030_s24 = sphi %s2144_s24, %s2841_s24   ;;  %s2026_s23 = sphi %s2142_s23, %s2843_s23   ;;  %s2022_s22 = sphi %s2140_s22, %s2845_s22   ;;  %s2018_s1 = sphi %s2138_s1, %s2844_s1  }
   0xc   : > { %2822 = sst [smem:[#allocation7_spill]] %s2026_s23  ;;  %s1780_s25 = sadd.s32 4294967294, %s2030_s24  }
   0xd   : > { %2823 = sst [smem:[#allocation8_spill]] %s2030_s24  ;;  %s2163_s3 = sadd.s32 1, %s2030_s24  }
   0xe   : > { %2824 = sst [smem:[#allocation9_spill]] %s2163_s3  ;;  %s470_s26 = sadd.s32 1, %s2026_s23 }
   0xf   : > { %s467_s27 = ssub.s32 %s2030_s24, %s2163_s3  ;;  %p480_p0 = scmp.ne.s32.totalorder %s2026_s23, %s2022_s22 }
  0x10   : > { %p468_p1 = scmp.eq.s32.totalorder %s467_s27, 0  ;;  %p481_p2 = scmp.eq.s32.totalorder %s2159_s2, 1 }
  0x11   : > { %p486_p3 = scmp.ne.s32.totalorder %s2022_s22, %s2018_s1  ;;  %p487_p4 = scmp.eq.s32.totalorder %s1780_s25, 1 }
  0x12   : > { %s2174_s28 = scalar_select %p468_p1, %s2026_s23, %s470_s26  }
  0x13   : > { %p2176_p5 = por %p481_p2, %p480_p0  ;;  %p2180_p6 = por %p487_p4, %p486_p3 }
  0x14   : > { %2825 = sst [smem:[#allocation10_spill]] %s2174_s28  ;;  %p1783_p7 = scmp.ge.s32.totalorder %s2030_s24, 1 }
  0x15   : > { %s2827_s29 = scalar_select %p2180_p6, 1, 0 }
  0x16   : > { %p572_p8 = scmp.lt.s32.totalorder %s2030_s24, 3 }
  0x17   : > { %2828 = sst [smem:[#allocation11_spill]] %s2827_s29 }
  0x18   : > { %p573_p9 = pnand %p1783_p7, %p572_p8 }
  0x19   : > { %p632_p10 = scmp.lt.s32.totalorder (!%p573_p9), %s2159_s2, 1  ;;  %s2829_s26 = sld [smem:[#allocation12_spill]] (!%p573_p9) }
  0x1a   : > { %576 = sbr.rel (%p573_p9) target bundleno = 4182 (0x1056), region = 100  ;;  %s2830_s25 = sld [smem:[#allocation16_spill]] (!%p573_p9) }
  0x1b   : > { %s2831_s6 = sld [smem:[#allocation18_spill]] (!%p573_p9)  ;;  %s629_s29 = sand.u32 (!%p573_p9), 1, %s2022_s22  }
  0x1c   : > { %s2832_s5 = sld [smem:[#allocation17_spill]] (!%p573_p9) }
  0x1d   : > { %s2834_s28 = sld [smem:[#allocation15_spill]] (!%p573_p9) }
  0x1e   : > { %s2835_s1 = sld [smem:[#allocation13_spill]] (!%p573_p9) }
  0x1f   : > { %s2188_s30 = scalar_select %p632_p10, %s2159_s2, 1  ;;  %vm660_vm0 = vcmask 261120   ;;  %v2032_v2 = vmov 32.0   ;;  %v854_v51 = vld [vmem:[%s2796_s10 + $0x8] sm:$0xff]  ;;  %v853_v52 = vld [vmem:[%s2796_s10] sm:$0xff]  ;;  %vm772_vm5 = vcmask 130048  }
  0x20   : > { %1944 = vrcp.f32 %v2032_v2  ;;  %v697_v14 = vld [vmem:[%s2830_s25 + $0x18] sm:$0xff]  ;;  %v696_v18 = vld [vmem:[%s2830_s25 + $0x10] sm:$0xff]  ;;  %v695_v22 = vld [vmem:[%s2830_s25 + $0x8] sm:$0xff]  ;;  %vm805_vm7 = vcmask 64512  }
  0x21   : > { %s1785_s0 = sshll.u32 %s2188_s30, 3  ;;  %v750_v15 = vld [vmem:[%s2831_s6 + $0x18] sm:$0xff]  ;;  %714 = vmatpush.msra.mxu0 %v697_v14  ;;  %v749_v19 = vld [vmem:[%s2831_s6 + $0x10] sm:$0xff]  ;;  %v748_v23 = vld [vmem:[%s2831_s6 + $0x8] sm:$0xff] }
  0x22   : > { %s635_s27 = scalar_lea.vmem %s2829_s26, %s1785_s0  ;;  %v1796_v16 = vld [vmem:[%s2830_s25 + $0x38] sm:$0xff]  ;;  %764 = vmatpush.msra.mxu3 %v750_v15  ;;  %v1795_v20 = vld [vmem:[%s2830_s25 + $0x30] sm:$0xff]  ;;  %v1794_v24 = vld [vmem:[%s2830_s25 + $0x28] sm:$0xff]  ;;  %s2833_s26 = sld [smem:[#allocation14_spill]] }
  0x23   : > { %v2194_v0 = vld [vmem:[%s635_s27] sm:$0xff]  ;;  %v1801_v17 = vld [vmem:[%s2832_s5 + $0x38] sm:$0xff]  ;;  %898 = vmatpush.msra.mxu1 %v1796_v16  ;;  %715 = vmatpush.msra.mxu0 %v696_v18  ;;  %v1800_v21 = vld [vmem:[%s2832_s5 + $0x30] sm:$0xff] }
  0x24   : > { %v661_v1 = vsel %vm660_vm0, %v2194_v0, 0.0  ;;  %924 = vmatpush.msra.mxu2 %v1801_v17  ;;  %765 = vmatpush.msra.mxu3 %v749_v19  ;;  %v1799_v25 = vld [vmem:[%s2832_s5 + $0x28] sm:$0xff]  ;;  %v694_v26 = vld [vmem:[%s2830_s25] sm:$0xff]  ;;  %v725_v30 = vld [vmem:[%s2832_s5 + $0x18] sm:$0xff]  ;;  %s638_s24 = scalar_lea.vmem %s2835_s1, %s2188_s30  ;;  %s1784_s1 = sshll.u32 %s629_s29, 3 }
  0x25   : > { %662 = vadd.xlane.f32.xlu0 %v661_v1  ;;  %899 = vmatpush.msra.mxu1 %v1795_v20  ;;  %v747_v27 = vld [vmem:[%s2831_s6] sm:$0xff]  ;;  %v724_v31 = vld [vmem:[%s2832_s5 + $0x10] sm:$0xff]  ;;  %v723_v33 = vld [vmem:[%s2832_s5 + $0x8] sm:$0xff]  ;;  %s1988_s30 = scalar_lea.hbm %s2806_s20, 16 }
  0x26   : > { %v1945_v3 = vpop.eup %1944  ;;  %925 = vmatpush.msra.mxu2 %v1800_v21  ;;  %716 = vmatpush.msra.mxu0 %v695_v22  ;;  %v1793_v28 = vld [vmem:[%s2830_s25 + $0x20] sm:$0xff] }
  0x27   : > { %v665_v4 = vmul.f32 32.0, %v1945_v3  ;;  %vm669_vm1 = vweird.f32 %v1945_v3  ;;  %766 = vmatpush.msra.mxu3 %v748_v23  ;;  %900 = vmatpush.msra.mxu1 %v1794_v24  ;;  %v1798_v29 = vld [vmem:[%s2832_s5 + $0x20] sm:$0xff]  ;;  %v1806_v23 = vld [vmem:[%s2831_s6 + $0x38] sm:$0xff]  ;;  %v1805_v24 = vld [vmem:[%s2831_s6 + $0x30] sm:$0xff] }
  0x28   : > { %926 = vmatpush.msra.mxu2 %v1799_v25  ;;  %717 = vmatpush.msra.mxu0 %v694_v26  ;;  %v722_v35 = vld [vmem:[%s2832_s5] sm:$0xff]  ;;  %v1804_v25 = vld [vmem:[%s2831_s6 + $0x28] sm:$0xff] }
  0x29   : > { %v666_v5 = vsub.f32 1.0, %v665_v4  ;;  %767 = vmatpush.msra.mxu3 %v747_v27  ;;  %901 = vmatpush.msra.mxu1 %v1793_v28  ;;  %v2267_v41 = vld [vmem:[%s2833_s26] sm:$0x3]  ;;  %s631_s26 = scalar_lea.vmem [#allocation3], %s1784_s1 }
  0x2a   : > { %927 = vmatpush.msra.mxu2 %v1798_v29  ;;  %739 = vmatpush.msrb.mxu0 %v725_v30  ;;  %v2272_v43 = vld [vmem:[%s2834_s28] sm:$0x3]  ;;  %v690_v45 = vperm.slane %v2267_v41, 0  ;;  %s1709_s27 = sshll.u32 %s631_s26, 4  ;;  %s1697_s28 = scalar_lea.sflag [#allocation4], %s629_s29  ;;  %s1710_s27 = int_to_ptr.vmem [resolvable:$true] %s1709_s27 }
  0x2b   : > { %v667_v6 = vmul.f32 %v1945_v3, %v666_v5  ;;  %v692_v47 = vperm.slane %v2272_v43, 0  ;;  %v652_v54 = vld [vmem:[%s2794_s8] sm:$0x3] }
  0x2c   : > { %740 = vmatpush.msrb.mxu0 %v724_v31  ;;  %v2300_v55 = vld [vmem:[%s2795_s9] sm:$0x3]  ;;  %v911_v56 = vperm.slane %v652_v54, 1  ;;  %v726_v58 = vperm.slane %v652_v54, 0 }
  0x2d   : > { %v668_v7 = vadd.f32 %v1945_v3, %v667_v6  ;;  %v2305_v57 = vld [vmem:[%s2793_s7] sm:$0x3]  ;;  %v751_v59 = vperm.slane %v2300_v55, 0 }
  0x2e   : > { %741 = vmatpush.msrb.mxu0 %v723_v33  ;;  %v698_v62 = vperm.slane %v2305_v57, 0  ;;  %v640_v5 = vld [vmem:[%s638_s24] sm:$0x1]  ;;  %s1896_s24 = sshll.u32 %s2159_s2, 3 }
  0x2f   : > { %v2198_v8 = vsel %vm669_vm1, %v1945_v3, %v668_v7  ;;  %v641_v6 = vsub.f32 1.0, %v640_v5  ;;  %v643_v7 = vlaneseq  ;;  %v1803_v26 = vld [vmem:[%s2831_s6 + $0x20] sm:$0xff]  ;;  %s1707_s21 = scalar_lea.hbm %s2806_s20, %s1896_s24 }
  0x30   : > { %742 = vmatpush.msrb.mxu0 %v722_v35  ;;  %s1711_s23 = sshll.u32 %s1707_s21, 4  ;;  %s1712_s23 = int_to_ptr.hbm [resolvable:$true] %s1711_s23 }
  0x31   : > { %s1982_s3 = sshra.s32 %s1712_s23, 4  ;;  %s1983_s3 = int_to_ptr.hbm [resolvable:$true] %s1982_s3 }
  0x32   : > { %p1989_p0 = scmp.lt.s32.totalorder %s1983_s3, %s2806_s20 }
  0x98   : > { %v663_v9 = vpop.xlane.xlu0 %662 }
  0x99   : > { %v671_v10 = vmul.f32 %v2198_v8, %v663_v9  ;;  %v642_v9 = vmul.f32 -1e+09, %v641_v6 }
  0x9b   : > { %v672_v11 = vsub.f32 %v2194_v0, %v671_v10  ;;  %v2316_v10 = vshrl.u32 %v643_v7, 7 }
  0x9d   : > { %v673_v12 = vmul.f32 %v672_v11, %v672_v11 }
  0x9f   : > { %v674_v13 = vsel %vm660_vm0, %v673_v12, 0.0  ;;  %v2320_v12 = vperm.slane %v642_v9, 0 }
  0xa0   : > { %675 = vadd.xlane.f32.xlu0 %v674_v13 }
 0x113   : > { %v676_v32 = vpop.xlane.xlu0 %675 }
 0x114   : > { %v677_v34 = vmul.f32 %v676_v32, %v2198_v8 }
 0x116   : > { %v678_v36 = vadd.f32 1e-05, %v677_v34 }
 0x118   : > { %1946 = vrsqrt.f32 %v678_v36  ;;  %vm685_vm3 = vweird.f32 %v678_v36 }
 0x11e   : > { %v1947_v37 = vpop.eup %1946 }
 0x11f   : > { %v680_v38 = vmul.f32 %v1947_v37, %v678_v36  ;;  %vm686_vm2 = vweird.f32 %v1947_v37 }
 0x120   : > { %vm687_vm4 = vmor %vm685_vm3, %vm686_vm2 }
 0x121   : > { %v681_v39 = vmul.f32 %v1947_v37, %v680_v38 }
 0x123   : > { %v682_v40 = vmul.f32 0.5, %v681_v39 }
 0x125   : > { %v683_v42 = vsub.f32 1.5, %v682_v40  ;;  %v885_v40 = vperm.slane %v2305_v57, 1 }
 0x127   : > { %v684_v44 = vmul.f32 %v1947_v37, %v683_v42 }
 0x129   : > { %v688_v46 = vsel %vm687_vm4, %v1947_v37, %v684_v44  ;;  %v937_v44 = vperm.slane %v2300_v55, 1 }
 0x12a   : > { %v689_v48 = vmul.f32 %v688_v46, %v672_v11  ;;  %v2318_v11 = vand.u32 127, %v643_v7 }
 0x12c   : > { %v691_v49 = vmul.f32 %v690_v45, %v689_v48  ;;  %vm647_vm6 = vcmp.le.s32.totalorder %v2318_v11, %v2316_v10 }
 0x12e   : > { %v2276_v50 = vadd.f32 %v692_v47, %v691_v49 }
 0x130   : > { %1786 = vmatmul.msk.f32.vlgmr.msra.gmra.mxu0 %vm660_vm0, %v2276_v50  ;;  %1788 = vmatmul.msk.f32.vlgmr.msra.gmra.mxu3 %vm660_vm0, %v2276_v50 }
 0x131   : > { %1797 = vmatmul.msk.f32.vlgmr.msra.gmra.mxu1 %vm660_vm0, %v2276_v50  ;;  %1802 = vmatmul.msk.f32.vlgmr.msra.gmra.mxu2 %vm660_vm0, %v2276_v50 }
 0x132   : > { %872 = vmatpush.msra.mxu0 %v854_v51 }
 0x134   : > { %873 = vmatpush.msra.mxu0 %v853_v52 }
 0x138   : > { %1787 = vmatmul.msk.f32.vlgmr.msrb.gmra.mxu0 %vm660_vm0, %v2276_v50 }
 0x1ad   : > { %v719_v53 = vpop.f32.mrf.mxu0 }
 0x1ae   : > { %v720_v4 = vadd.f32 %v719_v53, %v698_v62  ;;  %v903_v42 = vpop.f32.mrf.mxu1 }
 0x1af   : > { %v904_v45 = vadd.f32 %v903_v42, %v885_v40  ;;  %v1095_v40 = vld [vmem:[%s2801_s15] sm:$0xff] }
 0x1b0   : > { %v2437_v42 = vld [vmem:[%s2799_s13] sm:$0x3] }
 0x1b3   : > { %v769_v60 = vpop.f32.mrf.mxu3 }
 0x1b4   : > { %v929_v61 = vpop.f32.mrf.mxu2  ;;  %v770_v3 = vadd.f32 %v769_v60, %v751_v59  ;;  %v1812_v59 = vld [vmem:[%s2796_s10 + $0x18] sm:$0xff] }
 0x1b5   : > { %v930_v63 = vadd.f32 %v929_v61, %v911_v56  ;;  %v744_v1 = vpop.f32.mrf.mxu0  ;;  %1054 = vmatpush.msrb.mxu2 %v1812_v59 }
 0x1b6   : > { %v745_v2 = vadd.f32 %v744_v1, %v726_v58 }
 0x1b7   : > { %1808 = vmatpush.xpose.msk.msrb.mxu0 %vm772_vm5, %v930_v63 }
 0x1b8   : > { %1789 = vmatpush.xpose.msk.msrb.mxu3 %vm772_vm5, %v745_v2 }
 0x1bb   : > { %1790 = vmatmul.msk.f32.vlgmr.msrb.gmra.mxu3 %vm772_vm5, %v720_v4 }
 0x1bc   : > { %848 = vmatpush.msra.mxu3 %v770_v3 }
 0x1be   : > { %950 = vmatpush.msrb.mxu3 %v1806_v23  ;;  %v1106_v23 = vld [vmem:[%s2801_s15 + $0x58] sm:$0xff] }
 0x1c0   : > { %951 = vmatpush.msrb.mxu3 %v1805_v24  ;;  %v1105_v24 = vld [vmem:[%s2801_s15 + $0x50] sm:$0xff] }
 0x1c2   : > { %952 = vmatpush.msrb.mxu3 %v1804_v25  ;;  %v1104_v25 = vld [vmem:[%s2801_s15 + $0x48] sm:$0xff] }
 0x1c4   : > { %953 = vmatpush.msrb.mxu3 %v1803_v26  ;;  %v1103_v26 = vld [vmem:[%s2801_s15 + $0x40] sm:$0xff] }
 0x23e   : > { %v796_v13 = vpop.f32.mrf.mxu3 }
 0x23f   : > { %v799_v14 = vmul.f32 0.25, %v796_v13  ;;  %v1811_v13 = vld [vmem:[%s2796_s10 + $0x10] sm:$0xff] }
 0x240   : > { %1055 = vmatpush.msrb.mxu2 %v1811_v13 }
 0x241   : > { %v803_v15 = vadd.f32 %v2320_v12, %v799_v14  ;;  %v1065_v14 = vld [vmem:[%s2798_s12 + $0x18] sm:$0xff] }
 0x243   : > { %v804_v16 = vsel %vm647_vm6, %v803_v15, -1e+09 }
 0x244   : > { %v806_v17 = vsel %vm805_vm7, %v804_v16, -inf }
 0x245   : > { %807 = vmax.xlane.f32.xlu1 %v806_v17  ;;  %v1063_v17 = vld [vmem:[%s2798_s12 + $0x8] sm:$0xff] }
 0x2b8   : > { %v808_v18 = vpop.xlane.xlu1 %807 }
 0x2b9   : > { %v809_v19 = vsub.f32 %v804_v16, %v808_v18  ;;  %v1064_v16 = vld [vmem:[%s2798_s12 + $0x10] sm:$0xff]  ;;  %v1062_v18 = vld [vmem:[%s2798_s12] sm:$0xff] }
 0x2bb   : > { %v810_v20 = vmul.f32 1.442695, %v809_v19  ;;  %v1110_v19 = vld [vmem:[%s2801_s15 + $0x78] sm:$0xff] }
 0x2bd   : > { %1948 = vpow2.f32 %v810_v20  ;;  %v1109_v20 = vld [vmem:[%s2801_s15 + $0x70] sm:$0xff] }
 0x2c3   : > { %v1949_v21 = vpop.eup %1948 }
 0x2c4   : > { %v812_v22 = vsel %vm805_vm7, %v1949_v21, 0.0 }
 0x2c5   : > { %813 = vadd.xlane.f32.xlu1 %v812_v22  ;;  %v1107_v22 = vld [vmem:[%s2801_s15 + $0x60] sm:$0xff] }
 0x338   : > { %v814_v27 = vpop.xlane.xlu1 %813 }
 0x339   : > { %1950 = vrcp.f32 %v814_v27  ;;  %v826_v31 = vand.u32 2147483648, %v814_v27  ;;  %v824_v33 = vand.u32 2147483647, %v814_v27  ;;  %vm820_vm9 = vweird.f32 %v814_v27 }
 0x33b   : > { %v827_v35 = vor.u32 1.1754944e-38, %v826_v31  ;;  %vm825_vm11 = vcmp.eq.f32.partialorder %v824_v33, 8.507059e+37  ;;  %v1099_v31 = vld [vmem:[%s2801_s15 + $0x20] sm:$0xff]  ;;  %v1098_v33 = vld [vmem:[%s2801_s15 + $0x18] sm:$0xff] }
 0x33f   : > { %v1951_v28 = vpop.eup %1950 }
 0x340   : > { %v816_v29 = vmul.f32 %v1951_v28, %v814_v27  ;;  %vm821_vm8 = vweird.f32 %v1951_v28  ;;  %v1102_v27 = vld [vmem:[%s2801_s15 + $0x38] sm:$0xff] }
 0x341   : > { %vm822_vm10 = vmor %vm820_vm9, %vm821_vm8 }
 0x342   : > { %v817_v30 = vsub.f32 1.0, %v816_v29  ;;  %v1100_v29 = vld [vmem:[%s2801_s15 + $0x28] sm:$0xff] }
 0x344   : > { %v818_v32 = vmul.f32 %v1951_v28, %v817_v30  ;;  %v2413_v30 = vld [vmem:[%s2797_s11] sm:$0x3] }
 0x346   : > { %v819_v34 = vadd.f32 %v1951_v28, %v818_v32  ;;  %v878_v32 = vperm.slane %v2413_v30, 0 }
 0x348   : > { %v823_v36 = vsel %vm822_vm10, %v1951_v28, %v819_v34  ;;  %v1101_v28 = vld [vmem:[%s2801_s15 + $0x30] sm:$0xff] }
 0x349   : > { %v828_v37 = vsel %vm825_vm11, %v827_v35, %v823_v36  ;;  %v1097_v34 = vld [vmem:[%s2801_s15 + $0x10] sm:$0xff] }
 0x34a   : > { %v829_v38 = vmul.f32 %v1949_v21, %v828_v37  ;;  %v1108_v21 = vld [vmem:[%s2801_s15 + $0x68] sm:$0xff] }
 0x34c   : > { %1791 = vmatmul.msk.f32.vlgmr.msra.gmra.mxu3 %vm805_vm7, %v829_v38 }
 0x34d   : > { %1082 = vmatpush.msra.mxu3 %v1065_v14 }
 0x34f   : > { %1083 = vmatpush.msra.mxu3 %v1064_v16 }
 0x351   : > { %1084 = vmatpush.msra.mxu3 %v1063_v17 }
 0x353   : > { %1085 = vmatpush.msra.mxu3 %v1062_v18 }
 0x354   : > { %1807 = vmatmul.msk.f32.vlgmr.msrb.gmra.mxu3 %vm660_vm0, %v2276_v50 }
 0x3cf   : > { %v850_v39 = vpop.f32.mrf.mxu3 }
 0x3d0   : > { %1792 = vmatmul.msk.f32.vlgmr.msra.gmra.mxu0 %vm772_vm5, %v850_v39  ;;  %v1096_v39 = vld [vmem:[%s2801_s15 + $0x8] sm:$0xff] }
 0x3d1   : > { %1112 = vmatpush.msra.mxu0 %v1110_v19 }
 0x3d3   : > { %1113 = vmatpush.msra.mxu0 %v1109_v20 }
 0x3d5   : > { %1114 = vmatpush.msra.mxu0 %v1108_v21 }
 0x3d7   : > { %v955_v46 = vpop.f32.mrf.mxu3  ;;  %1115 = vmatpush.msra.mxu0 %v1107_v22  ;;  %v1155_v22 = vperm.slane %v2267_v41, 1  ;;  %v2519_v41 = vld [vmem:[%s2794_s8 + $0x2] sm:$0x3] }
 0x3d8   : > { %v956_v47 = vadd.f32 %v955_v46, %v937_v44  ;;  %1809 = vmatmul.msk.f32.vlgmr.msrb.gmra.mxu0 %vm772_vm5, %v904_v45  ;;  %v1066_v44 = vperm.slane %v2437_v42, 0 }
 0x3d9   : > { %1116 = vmatpush.msra.mxu0 %v1106_v23 }
 0x3da   : > { %1029 = vmatpush.msrb.mxu1 %v956_v47 }
 0x3db   : > { %1117 = vmatpush.msra.mxu0 %v1105_v24  ;;  %v1157_v24 = vperm.slane %v2272_v43, 1  ;;  %v2524_v43 = vld [vmem:[%s2795_s9 + $0x2] sm:$0x3] }
 0x3dd   : > { %1118 = vmatpush.msra.mxu0 %v1104_v25 }
 0x3df   : > { %1119 = vmatpush.msra.mxu0 %v1103_v26 }
 0x3e1   : > { %1120 = vmatpush.msra.mxu0 %v1102_v27 }
 0x3e3   : > { %1121 = vmatpush.msra.mxu0 %v1101_v28  ;;  %v2529_v28 = vld [vmem:[%s2793_s7 + $0x2] sm:$0x3] }
 0x3e5   : > { %1122 = vmatpush.msra.mxu0 %v1100_v29  ;;  %v1193_v29 = vperm.slane %v2519_v41, 0 }
 0x3e7   : > { %1123 = vmatpush.msra.mxu0 %v1099_v31  ;;  %v1219_v31 = vperm.slane %v2524_v43, 0 }
 0x3e9   : > { %1124 = vmatpush.msra.mxu0 %v1098_v33 }
 0x3eb   : > { %1125 = vmatpush.msra.mxu0 %v1097_v34 }
 0x3ed   : > { %1126 = vmatpush.msra.mxu0 %v1096_v39 }
 0x3ef   : > { %1127 = vmatpush.msra.mxu0 %v1095_v40  ;;  %v1838_v40 = vld [vmem:[%s2830_s25 + $0x70] sm:$0xff] }
 0x44d   : > { %v2349_v48 = vpop.f32.mrf.mxu0 }
 0x44e   : > { %v879_v35 = vadd.f32 %v878_v32, %v2349_v48  ;;  %v1164_v32 = vperm.slane %v2529_v28, 0 }
 0x455   : > { %v981_v49 = vpop.f32.mrf.mxu0 }
 0x456   : > { %v984_v51 = vmul.f32 0.25, %v981_v49  ;;  %v2459_v49 = vld [vmem:[%s2802_s16] sm:$0x3] }
 0x458   : > { %v985_v50 = vadd.f32 %v984_v51, %v2320_v12  ;;  %v1111_v51 = vperm.slane %v2459_v49, 0 }
 0x45a   : > { %v986_v52 = vsel %vm647_vm6, %v985_v50, -1e+09 }
 0x45b   : > { %v987_v53 = vsel %vm805_vm7, %v986_v52, -inf }
 0x45c   : > { %988 = vmax.xlane.f32.xlu2 %v987_v53 }
 0x4cf   : > { %v989_v54 = vpop.xlane.xlu2 %988 }
 0x4d0   : > { %v990_v55 = vsub.f32 %v986_v52, %v989_v54 }
 0x4d2   : > { %v991_v56 = vmul.f32 1.442695, %v990_v55 }
 0x4d4   : > { %1952 = vpow2.f32 %v991_v56 }
 0x4da   : > { %v1953_v57 = vpop.eup %1952 }
 0x4db   : > { %v993_v58 = vsel %vm805_vm7, %v1953_v57, 0.0 }
 0x4dc   : > { %994 = vadd.xlane.f32.xlu2 %v993_v58 }
 0x54f   : > { %v995_v60 = vpop.xlane.xlu2 %994 }
 0x550   : > { %1954 = vrcp.f32 %v995_v60  ;;  %v1007_v1 = vand.u32 2147483648, %v995_v60  ;;  %v1005_v3 = vand.u32 2147483647, %v995_v60  ;;  %vm1001_vm13 = vweird.f32 %v995_v60 }
 0x552   : > { %v1008_v5 = vor.u32 1.1754944e-38, %v1007_v1  ;;  %vm1006_vm15 = vcmp.eq.f32.partialorder %v1005_v3, 8.507059e+37  ;;  %v1822_v1 = vld [vmem:[%s2832_s5 + $0x50] sm:$0xff]  ;;  %v1816_v3 = vld [vmem:[%s2830_s25 + $0x48] sm:$0xff] }
 0x556   : > { %v1955_v61 = vpop.eup %1954 }
 0x557   : > { %v997_v62 = vmul.f32 %v1955_v61, %v995_v60  ;;  %vm1002_vm12 = vweird.f32 %v1955_v61  ;;  %v1818_v60 = vld [vmem:[%s2830_s25 + $0x58] sm:$0xff] }
 0x558   : > { %vm1003_vm14 = vmor %vm1001_vm13, %vm1002_vm12  ;;  %1180 = vmatpush.msra.mxu1 %v1818_v60  ;;  %v1844_v60 = vld [vmem:[%s2832_s5 + $0x78] sm:$0xff] }
 0x559   : > { %v998_v63 = vsub.f32 1.0, %v997_v62  ;;  %v1828_v62 = vld [vmem:[%s2831_s6 + $0x58] sm:$0xff] }
 0x55a   : > { %1232 = vmatpush.msrb.mxu3 %v1828_v62  ;;  %v1842_v62 = vld [vmem:[%s2832_s5 + $0x68] sm:$0xff] }
 0x55b   : > { %v999_v2 = vmul.f32 %v1955_v61, %v998_v63  ;;  %v1817_v63 = vld [vmem:[%s2830_s25 + $0x50] sm:$0xff] }
 0x55c   : > { %1181 = vmatpush.msra.mxu1 %v1817_v63  ;;  %v1841_v63 = vld [vmem:[%s2832_s5 + $0x60] sm:$0xff] }
 0x55d   : > { %v1000_v4 = vadd.f32 %v1955_v61, %v999_v2  ;;  %v1827_v2 = vld [vmem:[%s2831_s6 + $0x50] sm:$0xff] }
 0x55e   : > { %1233 = vmatpush.msrb.mxu3 %v1827_v2  ;;  %1182 = vmatpush.msra.mxu1 %v1816_v3 }
 0x55f   : > { %v1004_v6 = vsel %vm1003_vm14, %v1955_v61, %v1000_v4  ;;  %v1823_v61 = vld [vmem:[%s2832_s5 + $0x58] sm:$0xff]  ;;  %v1821_v4 = vld [vmem:[%s2832_s5 + $0x48] sm:$0xff] }
 0x560   : > { %v1009_v7 = vsel %vm1006_vm15, %v1008_v5, %v1004_v6  ;;  %1206 = vmatpush.msra.mxu2 %v1823_v61  ;;  %v1826_v5 = vld [vmem:[%s2831_s6 + $0x48] sm:$0xff]  ;;  %v1815_v6 = vld [vmem:[%s2830_s25 + $0x40] sm:$0xff]  ;;  %v1843_v61 = vld [vmem:[%s2832_s5 + $0x70] sm:$0xff] }
 0x561   : > { %v1010_v9 = vmul.f32 %v1953_v57, %v1009_v7  ;;  %v1820_v7 = vld [vmem:[%s2832_s5 + $0x40] sm:$0xff]  ;;  %1234 = vmatpush.msrb.mxu3 %v1826_v5  ;;  %1183 = vmatpush.msra.mxu1 %v1815_v6  ;;  %s1984_s5 = scalar_lea.hbm %s1983_s3, 8 }
 0x562   : > { %1207 = vmatpush.msra.mxu2 %v1822_v1  ;;  %v1834_v1 = vld [vmem:[%s2796_s10 + $0x28] sm:$0xff]  ;;  %p1985_p11 = scmp.ne.s32.totalorder %s1983_s3, %s1984_s5  ;;  %p1990_p1 = scmp.lt.s32.totalorder %s1988_s30, %s1984_s5 }
 0x563   : > { %1810 = vmatmul.msk.f32.vlgmr.msrb.gmra.mxu1 %vm805_vm7, %v1010_v9  ;;  %v1825_v9 = vld [vmem:[%s2831_s6 + $0x40] sm:$0xff] }
 0x564   : > { %1208 = vmatpush.msra.mxu2 %v1821_v4  ;;  %1235 = vmatpush.msrb.mxu3 %v1825_v9  ;;  %p1986_p12 = pnand %p1985_p11, %p2176_p5  ;;  %p1991_p2 = por %p1990_p1, %p1989_p0 }
 0x566   : > { %1209 = vmatpush.msra.mxu2 %v1820_v7  ;;  %p1987_p13 = pneg %p1986_p12 }
 0x568   : > { %p1992_p3 = pnand %p1991_p2, %p1987_p13 }
 0x5e0   : > { %v1031_v15 = vpop.f32.mrf.mxu1 }
 0x5e1   : > { %1813 = vmatmul.msk.f32.vlgmr.msrb.gmra.mxu2 %vm772_vm5, %v1031_v15 }
 0x664   : > { %v1057_v36 = vpop.f32.mrf.mxu2 }
 0x665   : > { %v1060_v37 = vadd.f32 %v1057_v36, %v879_v35 }
 0x667   : > { %v1061_v38 = vadd.f32 %v1060_v37, %v2194_v0  ;;  %v2442_v0 = vld [vmem:[%s2800_s14] sm:$0x3]  ;;  %v1839_v37 = vld [vmem:[%s2830_s25 + $0x78] sm:$0xff] }
 0x668   : > { %v1090_v45 = vperm.slane %v2442_v0, 0 }
 0x669   : > { %1814 = vmatmul.msk.f32.vlgmr.msra.gmra.mxu3 %vm660_vm0, %v1061_v38 }
 0x66a   : > { %1336 = vmatpush.msra.mxu3 %v1834_v1 }
 0x6ec   : > { %v1087_v46 = vpop.f32.mrf.mxu3 }
 0x6ed   : > { %v2446_v47 = vadd.f32 %v1087_v46, %v1066_v44  ;;  %v1837_v44 = vld [vmem:[%s2830_s25 + $0x68] sm:$0xff] }
 0x6ef   : > { %vm2449_vm1 = vcmp.gt.f32.partialorder %v2446_v47, %v1090_v45  ;;  %v1836_v45 = vld [vmem:[%s2830_s25 + $0x60] sm:$0xff] }
 0x6f0   : > { %1899 = vmatmul.msk.f32.vlgmr.msra.gmra.mxu0 %vm2449_vm1, %v2446_v47 }
 0x76d   : > { %v1129_v50 = vpop.f32.mrf.mxu0 }
 0x76e   : > { %v1130_v52 = vadd.f32 %v1129_v50, %v1111_v51 }
 0x770   : > { %v2462_v53 = vadd.f32 %v1130_v52, %v1061_v38 }
 0x772   : > { %v1133_v54 = vsel %vm660_vm0, %v2462_v53, 0.0 }
 0x773   : > { %1134 = vadd.xlane.f32.xlu0 %v1133_v54 }
 0x7e6   : > { %v1135_v55 = vpop.xlane.xlu0 %1134 }
 0x7e7   : > { %v1136_v56 = vmul.f32 %v1135_v55, %v2198_v8 }
 0x7e9   : > { %v1137_v57 = vsub.f32 %v2462_v53, %v1136_v56 }
 0x7eb   : > { %v1138_v58 = vmul.f32 %v1137_v57, %v1137_v57 }
 0x7ed   : > { %v1139_v59 = vsel %vm660_vm0, %v1138_v58, 0.0 }
 0x7ee   : > { %1140 = vadd.xlane.f32.xlu1 %v1139_v59 }
 0x861   : > { %v1141_v13 = vpop.xlane.xlu1 %1140 }
 0x862   : > { %v1142_v14 = vmul.f32 %v1141_v13, %v2198_v8 }
 0x864   : > { %v1143_v15 = vadd.f32 1e-05, %v1142_v14 }
 0x866   : > { %1956 = vrsqrt.f32 %v1143_v15  ;;  %vm1150_vm3 = vweird.f32 %v1143_v15 }
 0x86c   : > { %v1957_v16 = vpop.eup %1956 }
 0x86d   : > { %v1145_v17 = vmul.f32 %v1957_v16, %v1143_v15  ;;  %vm1151_vm2 = vweird.f32 %v1957_v16 }
 0x86e   : > { %vm1152_vm4 = vmor %vm1150_vm3, %vm1151_vm2 }
 0x86f   : > { %v1146_v18 = vmul.f32 %v1957_v16, %v1145_v17 }
 0x871   : > { %v1147_v19 = vmul.f32 0.5, %v1146_v18  ;;  %v1833_v18 = vld [vmem:[%s2796_s10 + $0x20] sm:$0xff] }
 0x872   : > { %1337 = vmatpush.msra.mxu3 %v1833_v18  ;;  %v1859_v18 = vld [vmem:[%s2798_s12 + $0x30] sm:$0xff] }
 0x873   : > { %v1148_v20 = vsub.f32 1.5, %v1147_v19  ;;  %v1849_v19 = vld [vmem:[%s2831_s6 + $0x78] sm:$0xff] }
 0x875   : > { %v1149_v21 = vmul.f32 %v1957_v16, %v1148_v20  ;;  %v1848_v20 = vld [vmem:[%s2831_s6 + $0x70] sm:$0xff] }
 0x877   : > { %v1153_v23 = vsel %vm1152_vm4, %v1957_v16, %v1149_v21  ;;  %v1847_v21 = vld [vmem:[%s2831_s6 + $0x68] sm:$0xff] }
 0x878   : > { %v1154_v25 = vmul.f32 %v1153_v23, %v1137_v57 }
 0x87a   : > { %v1156_v26 = vmul.f32 %v1155_v22, %v1154_v25  ;;  %v1846_v22 = vld [vmem:[%s2831_s6 + $0x60] sm:$0xff]  ;;  %v1349_v25 = vperm.slane %v2529_v28, 1  ;;  %v1875_v28 = vld [vmem:[%s2801_s15 + $0x168] sm:$0xff] }
 0x87c   : > { %v2508_v27 = vadd.f32 %v1157_v24, %v1156_v26  ;;  %v1375_v24 = vperm.slane %v2519_v41, 1  ;;  %v1876_v41 = vld [vmem:[%s2801_s15 + $0x170] sm:$0xff] }
 0x87e   : > { %1819 = vmatmul.msk.f32.vlgmr.msra.gmra.mxu1 %vm660_vm0, %v2508_v27  ;;  %1824 = vmatmul.msk.f32.vlgmr.msra.gmra.mxu2 %vm660_vm0, %v2508_v27 }
 0x87f   : > { %1829 = vmatmul.msk.f32.vlgmr.msrb.gmra.mxu3 %vm660_vm0, %v2508_v27 }
 0x880   : > { %1414 = vmatpush.msrb.mxu3 %v1849_v19  ;;  %v1858_v19 = vld [vmem:[%s2798_s12 + $0x28] sm:$0xff] }
 0x882   : > { %1415 = vmatpush.msrb.mxu3 %v1848_v20  ;;  %v1857_v20 = vld [vmem:[%s2798_s12 + $0x20] sm:$0xff] }
 0x884   : > { %1416 = vmatpush.msrb.mxu3 %v1847_v21  ;;  %v1893_v21 = vld [vmem:[%s2801_s15 + $0x1f8] sm:$0xff] }
 0x886   : > { %1417 = vmatpush.msrb.mxu3 %v1846_v22  ;;  %v1892_v22 = vld [vmem:[%s2801_s15 + $0x1f0] sm:$0xff] }
 0x8fb   : > { %v1185_v34 = vpop.f32.mrf.mxu1 }
 0x8fc   : > { %v1186_v39 = vadd.f32 %v1185_v34, %v1164_v32  ;;  %v1877_v32 = vld [vmem:[%s2801_s15 + $0x178] sm:$0xff] }
 0x8fd   : > { %v1873_v34 = vld [vmem:[%s2801_s15 + $0x158] sm:$0xff] }
 0x901   : > { %v1211_v33 = vpop.f32.mrf.mxu2 }
 0x902   : > { %v1212_v35 = vadd.f32 %v1211_v33, %v1193_v29  ;;  %v1237_v36 = vpop.f32.mrf.mxu3 }
 0x903   : > { %v1238_v38 = vadd.f32 %v1237_v36, %v1219_v31  ;;  %v1871_v36 = vld [vmem:[%s2801_s15 + $0x148] sm:$0xff] }
 0x904   : > { %1830 = vmatpush.xpose.msk.msrb.mxu1 %vm772_vm5, %v1212_v35  ;;  %v1872_v35 = vld [vmem:[%s2801_s15 + $0x150] sm:$0xff] }
 0x905   : > { %1311 = vmatpush.msrb.mxu2 %v1238_v38  ;;  %v1869_v38 = vld [vmem:[%s2801_s15 + $0x138] sm:$0xff] }
 0x907   : > { %1831 = vmatmul.msk.f32.vlgmr.msrb.gmra.mxu1 %vm772_vm5, %v1186_v39  ;;  %1388 = vmatpush.msra.mxu2 %v1844_v60  ;;  %v1868_v39 = vld [vmem:[%s2801_s15 + $0x130] sm:$0xff] }
 0x908   : > { %1362 = vmatpush.msra.mxu1 %v1839_v37  ;;  %v1870_v37 = vld [vmem:[%s2801_s15 + $0x140] sm:$0xff] }
 0x909   : > { %1389 = vmatpush.msra.mxu2 %v1843_v61 }
 0x90a   : > { %1363 = vmatpush.msra.mxu1 %v1838_v40  ;;  %v1867_v40 = vld [vmem:[%s2801_s15 + $0x128] sm:$0xff] }
 0x90b   : > { %1390 = vmatpush.msra.mxu2 %v1842_v62 }
 0x90c   : > { %1364 = vmatpush.msra.mxu1 %v1837_v44  ;;  %v1866_v44 = vld [vmem:[%s2801_s15 + $0x120] sm:$0xff] }
 0x90d   : > { %1391 = vmatpush.msra.mxu2 %v1841_v63 }
 0x90e   : > { %1365 = vmatpush.msra.mxu1 %v1836_v45  ;;  %v1865_v45 = vld [vmem:[%s2801_s15 + $0x118] sm:$0xff] }
 0x90f   : > { %1840 = vmatmul.msk.f32.vlgmr.msra.gmra.mxu1 %vm660_vm0, %v2508_v27 }
 0x984   : > { %v1263_v46 = vpop.f32.mrf.mxu1 }
 0x985   : > { %v1266_v51 = vmul.f32 0.25, %v1263_v46  ;;  %v1864_v46 = vld [vmem:[%s2801_s15 + $0x110] sm:$0xff] }
 0x987   : > { %v1267_v50 = vadd.f32 %v1266_v51, %v2320_v12  ;;  %v1863_v51 = vld [vmem:[%s2801_s15 + $0x108] sm:$0xff] }
 0x989   : > { %v1268_v52 = vsel %vm647_vm6, %v1267_v50, -1e+09  ;;  %v1862_v50 = vld [vmem:[%s2801_s15 + $0x100] sm:$0xff] }
 0x98a   : > { %v1269_v54 = vsel %vm805_vm7, %v1268_v52, -inf }
 0x98b   : > { %1270 = vmax.xlane.f32.xlu2 %v1269_v54  ;;  %v1401_v54 = vperm.slane %v2524_v43, 1 }
 0x98c   : > { %v1367_v29 = vpop.f32.mrf.mxu1 }
 0x98d   : > { %v1368_v33 = vadd.f32 %v1367_v29, %v1349_v25  ;;  %v1889_v25 = vld [vmem:[%s2801_s15 + $0x1d8] sm:$0xff]  ;;  %v1887_v29 = vld [vmem:[%s2801_s15 + $0x1c8] sm:$0xff] }
 0x9fe   : > { %v1271_v55 = vpop.xlane.xlu2 %1270 }
 0x9ff   : > { %v1272_v56 = vsub.f32 %v1268_v52, %v1271_v55 }
 0xa01   : > { %v1273_v57 = vmul.f32 1.442695, %v1272_v56 }
 0xa03   : > { %1958 = vpow2.f32 %v1273_v57 }
 0xa09   : > { %v1959_v58 = vpop.eup %1958 }
 0xa0a   : > { %v1275_v59 = vsel %vm805_vm7, %v1959_v58, 0.0 }
 0xa0b   : > { %1276 = vadd.xlane.f32.xlu0 %v1275_v59 }
 0xa7e   : > { %v1277_v2 = vpop.xlane.xlu0 %1276 }
 0xa7f   : > { %1960 = vrcp.f32 %v1277_v2  ;;  %v1289_v6 = vand.u32 2147483648, %v1277_v2  ;;  %v1287_v9 = vand.u32 2147483647, %v1277_v2  ;;  %vm1283_vm9 = vweird.f32 %v1277_v2 }
 0xa81   : > { %v1290_v14 = vor.u32 1.1754944e-38, %v1289_v6  ;;  %vm1288_vm11 = vcmp.eq.f32.partialorder %v1287_v9, 8.507059e+37 }
 0xa85   : > { %v1961_v3 = vpop.eup %1960 }
 0xa86   : > { %v1279_v4 = vmul.f32 %v1961_v3, %v1277_v2  ;;  %vm1284_vm8 = vweird.f32 %v1961_v3 }
 0xa87   : > { %vm1285_vm10 = vmor %vm1283_vm9, %vm1284_vm8 }
 0xa88   : > { %v1280_v5 = vsub.f32 1.0, %v1279_v4 }
 0xa8a   : > { %v1281_v7 = vmul.f32 %v1961_v3, %v1280_v5 }
 0xa8c   : > { %v1282_v13 = vadd.f32 %v1961_v3, %v1281_v7 }
 0xa8e   : > { %v1286_v15 = vsel %vm1285_vm10, %v1961_v3, %v1282_v13 }
 0xa8f   : > { %v1291_v16 = vsel %vm1288_vm11, %v1290_v14, %v1286_v15  ;;  %v1854_v15 = vld [vmem:[%s2796_s10 + $0x30] sm:$0xff] }
 0xa90   : > { %v1292_v17 = vmul.f32 %v1959_v58, %v1291_v16  ;;  %v1860_v16 = vld [vmem:[%s2798_s12 + $0x38] sm:$0xff] }
 0xa91   : > { %1547 = vmatpush.msrb.mxu0 %v1860_v16 }
 0xa92   : > { %1832 = vmatmul.msk.f32.vlgmr.msrb.gmra.mxu2 %vm805_vm7, %v1292_v17 }
 0xa93   : > { %1548 = vmatpush.msrb.mxu0 %v1859_v18 }
 0xa95   : > { %1549 = vmatpush.msrb.mxu0 %v1858_v19 }
 0xa97   : > { %1550 = vmatpush.msrb.mxu0 %v1857_v20 }
 0xa9a   : > { %1845 = vmatmul.msk.f32.vlgmr.msra.gmra.mxu2 %vm660_vm0, %v2508_v27 }
 0xb15   : > { %v1313_v23 = vpop.f32.mrf.mxu2 }
 0xb16   : > { %1835 = vmatmul.msk.f32.vlgmr.msra.gmra.mxu3 %vm772_vm5, %v1313_v23  ;;  %v1891_v23 = vld [vmem:[%s2801_s15 + $0x1e8] sm:$0xff] }
 0xb1d   : > { %v1393_v26 = vpop.f32.mrf.mxu2 }
 0xb1e   : > { %v1394_v31 = vadd.f32 %v1393_v26, %v1375_v24  ;;  %1850 = vmatmul.msk.f32.vlgmr.msrb.gmra.mxu3 %vm660_vm0, %v2508_v27  ;;  %v1874_v27 = vld [vmem:[%s2801_s15 + $0x160] sm:$0xff]  ;;  %v1888_v26 = vld [vmem:[%s2801_s15 + $0x1d0] sm:$0xff] }
 0xb1f   : > { %v1890_v24 = vld [vmem:[%s2801_s15 + $0x1e0] sm:$0xff] }
 0xb20   : > { %1851 = vmatpush.xpose.msk.msrb.mxu1 %vm772_vm5, %v1394_v31  ;;  %v1886_v31 = vld [vmem:[%s2801_s15 + $0x1c0] sm:$0xff] }
 0xb23   : > { %1852 = vmatmul.msk.f32.vlgmr.msrb.gmra.mxu1 %vm772_vm5, %v1368_v33  ;;  %v1884_v33 = vld [vmem:[%s2801_s15 + $0x1b0] sm:$0xff] }
 0xb24   : > { %1595 = vmatpush.msra.mxu1 %v1877_v32  ;;  %v1885_v32 = vld [vmem:[%s2801_s15 + $0x1b8] sm:$0xff] }
 0xb26   : > { %1596 = vmatpush.msra.mxu1 %v1876_v41  ;;  %v1883_v41 = vld [vmem:[%s2801_s15 + $0x1a8] sm:$0xff] }
 0xb28   : > { %1597 = vmatpush.msra.mxu1 %v1875_v28  ;;  %v1882_v28 = vld [vmem:[%s2801_s15 + $0x1a0] sm:$0xff] }
 0xb2a   : > { %1598 = vmatpush.msra.mxu1 %v1874_v27  ;;  %v1342_v27 = vperm.slane %v2413_v30, 1  ;;  %v1879_v30 = vld [vmem:[%s2801_s15 + $0x188] sm:$0xff] }
 0xb2c   : > { %1599 = vmatpush.msra.mxu1 %v1873_v34  ;;  %v1881_v34 = vld [vmem:[%s2801_s15 + $0x198] sm:$0xff] }
 0xb2e   : > { %1600 = vmatpush.msra.mxu1 %v1872_v35  ;;  %v1880_v35 = vld [vmem:[%s2801_s15 + $0x190] sm:$0xff] }
 0xb30   : > { %1601 = vmatpush.msra.mxu1 %v1871_v36 }
 0xb32   : > { %1602 = vmatpush.msra.mxu1 %v1870_v37 }
 0xb34   : > { %1603 = vmatpush.msra.mxu1 %v1869_v38 }
 0xb36   : > { %1604 = vmatpush.msra.mxu1 %v1868_v39 }
 0xb38   : > { %1605 = vmatpush.msra.mxu1 %v1867_v40  ;;  %v1878_v40 = vld [vmem:[%s2801_s15 + $0x180] sm:$0xff] }
 0xb3a   : > { %1606 = vmatpush.msra.mxu1 %v1866_v44  ;;  %v1531_v44 = vperm.slane %v2437_v42, 1 }
 0xb3c   : > { %1607 = vmatpush.msra.mxu1 %v1865_v45  ;;  %v1555_v45 = vperm.slane %v2442_v0, 1 }
 0xb3e   : > { %1608 = vmatpush.msra.mxu1 %v1864_v46 }
 0xb40   : > { %1609 = vmatpush.msra.mxu1 %v1863_v51 }
 0xb42   : > { %1610 = vmatpush.msra.mxu1 %v1862_v50 }
 0xb43   : > { %1900 = vmatmul.msk.f32.vlgmr.msra.gmra.mxu1 %vm2449_vm1, %v2446_v47 }
 0xb99   : > { %v2647_v52 = vpop.f32.mrf.mxu3 }
 0xb9a   : > { %v1343_v36 = vadd.f32 %v1342_v27, %v2647_v52 }
 0xba0   : > { %v1445_v55 = vpop.f32.mrf.mxu1 }
 0xba1   : > { %v1448_v56 = vmul.f32 0.25, %v1445_v55  ;;  %v1419_v57 = vpop.f32.mrf.mxu3 }
 0xba2   : > { %v1420_v58 = vadd.f32 %v1419_v57, %v1401_v54 }
 0xba3   : > { %v1449_v59 = vadd.f32 %v1448_v56, %v2320_v12  ;;  %v1855_v12 = vld [vmem:[%s2796_s10 + $0x38] sm:$0xff] }
 0xba4   : > { %1493 = vmatpush.msrb.mxu2 %v1420_v58  ;;  %1518 = vmatpush.msra.mxu3 %v1855_v12 }
 0xba5   : > { %v1450_v60 = vsel %vm647_vm6, %v1449_v59, -1e+09 }
 0xba6   : > { %v1451_v61 = vsel %vm805_vm7, %v1450_v60, -inf  ;;  %1519 = vmatpush.msra.mxu3 %v1854_v15  ;;  %1615 = vmatpush.msra.mxu2 %v1893_v21 }
 0xba7   : > { %1452 = vmax.xlane.f32.xlu1 %v1451_v61  ;;  %v1670_v61 = vld [vmem:[%s2805_s19 + $0x10] sm:$0xff] }
 0xba8   : > { %1616 = vmatpush.msra.mxu2 %v1892_v22 }
 0xbaa   : > { %1617 = vmatpush.msra.mxu2 %v1891_v23 }
 0xbac   : > { %1618 = vmatpush.msra.mxu2 %v1890_v24 }
 0xbae   : > { %1619 = vmatpush.msra.mxu2 %v1889_v25 }
 0xbb0   : > { %1620 = vmatpush.msra.mxu2 %v1888_v26 }
 0xbb2   : > { %1621 = vmatpush.msra.mxu2 %v1887_v29 }
 0xbb4   : > { %1622 = vmatpush.msra.mxu2 %v1886_v31 }
 0xbb6   : > { %1623 = vmatpush.msra.mxu2 %v1885_v32 }
 0xbb8   : > { %1624 = vmatpush.msra.mxu2 %v1884_v33 }
 0xbba   : > { %1625 = vmatpush.msra.mxu2 %v1883_v41 }
 0xbbc   : > { %1626 = vmatpush.msra.mxu2 %v1882_v28 }
 0xbbe   : > { %1627 = vmatpush.msra.mxu2 %v1881_v34 }
 0xbc0   : > { %1628 = vmatpush.msra.mxu2 %v1880_v35  ;;  %v1612_v50 = vpop.f32.mrf.mxu1 }
 0xbc2   : > { %1629 = vmatpush.msra.mxu2 %v1879_v30 }
 0xbc4   : > { %1630 = vmatpush.msra.mxu2 %v1878_v40 }
 0xc1a   : > { %v1453_v48 = vpop.xlane.xlu1 %1452 }
 0xc1b   : > { %v1454_v47 = vsub.f32 %v1450_v60, %v1453_v48  ;;  %v1669_v48 = vld [vmem:[%s2805_s19 + $0x8] sm:$0xff] }
 0xc1d   : > { %v1455_v62 = vmul.f32 1.442695, %v1454_v47  ;;  %v1668_v47 = vld [vmem:[%s2805_s19] sm:$0xff] }
 0xc1f   : > { %1962 = vpow2.f32 %v1455_v62 }
 0xc25   : > { %v1963_v63 = vpop.eup %1962 }
 0xc26   : > { %v1457_v43 = vsel %vm805_vm7, %v1963_v63, 0.0 }
 0xc27   : > { %1458 = vadd.xlane.f32.xlu2 %v1457_v43 }
 0xc9a   : > { %v1459_v1 = vpop.xlane.xlu2 %1458 }
 0xc9b   : > { %1964 = vrcp.f32 %v1459_v1  ;;  %v1471_v3 = vand.u32 2147483648, %v1459_v1  ;;  %v1469_v5 = vand.u32 2147483647, %v1459_v1  ;;  %vm1465_vm12 = vweird.f32 %v1459_v1 }
 0xc9d   : > { %v1472_v7 = vor.u32 1.1754944e-38, %v1471_v3  ;;  %vm1470_vm14 = vcmp.eq.f32.partialorder %v1469_v5, 8.507059e+37 }
 0xca1   : > { %v1965_v10 = vpop.eup %1964 }
 0xca2   : > { %v1461_v11 = vmul.f32 %v1965_v10, %v1459_v1  ;;  %vm1466_vm6 = vweird.f32 %v1965_v10 }
 0xca3   : > { %vm1467_vm13 = vmor %vm1465_vm12, %vm1466_vm6 }
 0xca4   : > { %v1462_v2 = vsub.f32 1.0, %v1461_v11 }
 0xca6   : > { %v1463_v4 = vmul.f32 %v1965_v10, %v1462_v2 }
 0xca8   : > { %v1464_v6 = vadd.f32 %v1965_v10, %v1463_v4  ;;  %v1942_v4 = vld [vmem:[%s2803_s17] ss:$0 sm:$0xff] }
 0xcaa   : > { %v1468_v9 = vsel %vm1467_vm13, %v1965_v10, %v1464_v6 }
 0xcab   : > { %v1473_v13 = vsel %vm1470_vm14, %v1472_v7, %v1468_v9 }
 0xcac   : > { %v1474_v14 = vmul.f32 %v1963_v63, %v1473_v13 }
 0xcae   : > { %1853 = vmatmul.msk.f32.vlgmr.msrb.gmra.mxu2 %vm805_vm7, %v1474_v14 }
 0xd31   : > { %v1495_v17 = vpop.f32.mrf.mxu2 }
 0xd32   : > { %1856 = vmatmul.msk.f32.vlgmr.msra.gmra.mxu3 %vm772_vm5, %v1495_v17 }
 0xdb5   : > { %v1521_v37 = vpop.f32.mrf.mxu3 }
 0xdb6   : > { %v1524_v38 = vadd.f32 %v1521_v37, %v1343_v36 }
 0xdb8   : > { %v1525_v39 = vadd.f32 %v1524_v38, %v2462_v53  ;;  %v1594_v53 = vperm.slane %v2459_v49, 1  ;;  %v1671_v49 = vld [vmem:[%s2805_s19 + $0x18] sm:$0xff] }
 0xdb9   : > { %1687 = vmatpush.msrb.mxu3 %v1671_v49 }
 0xdba   : > { %1861 = vmatmul.msk.f32.vlgmr.msrb.gmra.mxu0 %vm660_vm0, %v1525_v39  ;;  %v1613_v52 = vadd.f32 %v1612_v50, %v1594_v53 }
 0xdbb   : > { %1688 = vmatpush.msrb.mxu3 %v1670_v61 }
 0xdbd   : > { %1689 = vmatpush.msrb.mxu3 %v1669_v48 }
 0xdbf   : > { %1690 = vmatpush.msrb.mxu3 %v1668_v47 }
 0xe37   : > { %v1552_v46 = vpop.f32.mrf.mxu0 }
 0xe38   : > { %v1553_v51 = vadd.f32 %v1552_v46, %v1531_v44 }
 0xe3a   : > { %vm1556_vm5 = vcmp.gt.f32.partialorder %v1553_v51, %v1555_v45 }
 0xe3b   : > { %1901 = vmatmul.msk.f32.vlgmr.msra.gmra.mxu2 %vm1556_vm5, %v1553_v51 }
 0xebe   : > { %v1632_v54 = vpop.f32.mrf.mxu2 }
 0xebf   : > { %v1633_v55 = vadd.f32 %v1632_v54, %v1613_v52 }
 0xec1   : > { %v1635_v56 = vadd.f32 %v1633_v55, %v1525_v39 }
 0xec3   : > { %v1638_v57 = vsel %vm660_vm0, %v1635_v56, 0.0 }
 0xec4   : > { %1639 = vadd.xlane.f32.xlu0 %v1638_v57 }
 0xf37   : > { %v1640_v58 = vpop.xlane.xlu0 %1639 }
 0xf38   : > { %v1641_v59 = vmul.f32 %v1640_v58, %v2198_v8 }
 0xf3a   : > { %v1642_v42 = vsub.f32 %v1635_v56, %v1641_v59 }
 0xf3c   : > { %v1643_v60 = vmul.f32 %v1642_v42, %v1642_v42 }
 0xf3e   : > { %v1644_v0 = vsel %vm660_vm0, %v1643_v60, 0.0 }
 0xf3f   : > { %1645 = vadd.xlane.f32.xlu1 %v1644_v0 }
 0xfb2   : > { %v1646_v62 = vpop.xlane.xlu1 %1645 }
 0xfb3   : > { %v1647_v63 = vmul.f32 %v1646_v62, %v2198_v8  ;;  %v1943_v8 = vld [vmem:[%s2804_s18] ss:$0 sm:$0xff] }
 0xfb5   : > { %v1648_v43 = vadd.f32 1e-05, %v1647_v63 }
 0xfb7   : > { %1966 = vrsqrt.f32 %v1648_v43  ;;  %vm1655_vm15 = vweird.f32 %v1648_v43 }
 0xfbd   : > { %v1967_v12 = vpop.eup %1966 }
 0xfbe   : > { %v1650_v1 = vmul.f32 %v1967_v12, %v1648_v43  ;;  %vm1656_vm7 = vweird.f32 %v1967_v12 }
 0xfbf   : > { %vm1657_vm1 = vmor %vm1655_vm15, %vm1656_vm7 }
 0xfc0   : > { %v1651_v10 = vmul.f32 %v1967_v12, %v1650_v1 }
 0xfc2   : > { %v1652_v11 = vmul.f32 0.5, %v1651_v10 }
 0xfc4   : > { %v1653_v2 = vsub.f32 1.5, %v1652_v11 }
 0xfc6   : > { %v1654_v3 = vmul.f32 %v1967_v12, %v1653_v2 }
 0xfc8   : > { %v1658_v5 = vsel %vm1657_vm1, %v1967_v12, %v1654_v3 }
 0xfc9   : > { %v1659_v6 = vmul.f32 %v1658_v5, %v1642_v42 }
 0xfcb   : > { %v1663_v7 = vmul.f32 %v1942_v4, %v1659_v6 }
 0xfcd   : > { %v1667_v9 = vadd.f32 %v1943_v8, %v1663_v7 }
 0xfcf   : > { %1894 = vmatmul.msk.f32.vlgmr.msrb.gmra.mxu3 %vm660_vm0, %v1667_v9 }
0x1052   : > { %v1692_v13 = vpop.f32.mrf.mxu3 }
0x1053   : > { %1695 = vst [vmem:[%s631_s26] sm:$0xff] %v1692_v13 }
0x1054   : > { %1995 = shalt.err (!%p1992_p3)
}
0x1055   : > { %1902 = dma.vmem_to_hbm [thread:$0]  (%p2176_p5), %s1710_s27, 128, %s1712_s23, %s1697_s28  }
0x1056 PF: > { %s2838_s29 = sld [smem:[#allocation8_spill]] }
0x1057   : > { %s2839_s0 = sld [smem:[#allocation6_spill]] }
0x105c   : > { %p1908_p4 = scmp.ge.s32.totalorder %s2838_s29, 2 }
0x105d   : > { %s1723_s26 = sand.u32 1, %s2839_s0  }
0x105e   : > { %p1905_p7 = pnand %p1908_p4, %p2180_p6  ;;  %s1724_s6 = scalar_lea.sflag [#allocation4], %s1723_s26 }
0x1060   : > { %p1906_p8 = pneg %p1905_p7 }
0x1062   : > { %2013 = dma.done.wait (%p1906_p8), %s1724_s6, 128  }
0x1063   : > { %2015 = vsyncadd (%p1906_p8), %s1724_s6, 4294967168  ;;  %s2841_s24 = sld [smem:[#allocation9_spill]]  ;;  %s2844_s1 = smov %s2022_s22 }
0x1064   : > { %s2842_s5 = sld [smem:[#allocation7_spill]] }
0x1065   : > { %s2843_s23 = sld [smem:[#allocation10_spill]] }
0x1069   : > { %p30_p9 = scmp.ge.s32.totalorder %s2841_s24, 4  }
0x106a   : > { %s2845_s22 = smov %s2842_s5 }
0x106b   :  { %32 = sbr.rel (!%p30_p9) target bundleno = 11 (0xb), region = 152 }
0x1070   :  { %1730 = vsyncpa [#allocation4], 1 }
0x1071   :  { %1732 = vsyncpa [#allocation4 + $0x1], 1 }

</bundles_post_ra>
